<compile_context>
chip_gen: v6e
topology: v6e:2x2x1
jax: 0.10.0
libtpu: 0.0.40
codegen_flags: <defaults>
</compile_context>

<pallas_src>
import numpy as np
import jax
import jax.numpy as jnp
from jax import lax
from jax.experimental import pallas as pl
from jax.experimental.pallas import tpu as pltpu

_LANE = 128                 # vreg lane width
_SUB = 8                    # f32 sublane tile
_TILE_BYTES = 4 << 20       # target input-block size (amortizes ~0.35us/step)
_MAX_TILE_ROWS = 8192       # bounds in-kernel mask intermediates for narrow dtypes
_SMALL_BYTES = 1 << 20      # below this, XLA's fused reduce beats any Pallas grid
_VMEM_LIMIT = 32 << 20      # 2 x 4MiB input buffers + intermediates, with headroom


def _reduce_dtype(dtype):
    """Dtype the reduction runs in (lossless for the input; min/max stay exact)."""
    dtype = jnp.dtype(dtype)
    if jnp.issubdtype(dtype, jnp.floating):
        return jnp.dtype(jnp.float32) if dtype.itemsize < 4 else dtype
    if jnp.issubdtype(dtype, jnp.signedinteger):
        return jnp.dtype(jnp.int32) if dtype.itemsize < 4 else dtype
    if jnp.issubdtype(dtype, jnp.unsignedinteger):
        return jnp.dtype(jnp.uint32) if dtype.itemsize < 4 else dtype
    return jnp.dtype(jnp.float32)


def _sentinels(rdtype):
    """(identity-for-min, identity-for-max) in the reduction dtype."""
    if jnp.issubdtype(rdtype, jnp.floating):
        return np.asarray(np.inf, rdtype), np.asarray(-np.inf, rdtype)
    info = jnp.iinfo(rdtype)
    return np.asarray(info.max, rdtype), np.asarray(info.min, rdtype)


def _make_minmax_kernel(rows, tile_rows, blocks_per_slice, rdtype, pos, neg):
    groups = tile_rows // _SUB

    def kernel(x_ref, mn_ref, mx_ref):
        k = pl.program_id(1)                       # reduction step within a slice

        @pl.when(k == 0)
        def _():                                   # per-slice accumulator init
            mn_ref[...] = jnp.full(mn_ref.shape, pos, dtype=rdtype)
            mx_ref[...] = jnp.full(mx_ref.shape, neg, dtype=rdtype)

        blk = pl.program_id(0) * blocks_per_slice + k   # un-clamped block id
        row_off = blk * tile_rows
        xb = x_ref[...].astype(rdtype)             # DMA stays in native dtype

        def accumulate(x_min, x_max):
            # Pure element-wise vreg mins/maxes: fold (groups, 8, 128) along
            # the leading axis into the resident (1, 8, 128) output block.
            # Cross-sublane/cross-lane reduction happens once in the wrapper.
            mn_ref[...] = jnp.minimum(
                mn_ref[...],
                jnp.min(x_min.reshape(groups, _SUB, _LANE), axis=0)[None])
            mx_ref[...] = jnp.maximum(
                mx_ref[...],
                jnp.max(x_max.reshape(groups, _SUB, _LANE), axis=0)[None])

        @pl.when(row_off + tile_rows <= rows)      # hot path: full block, no mask
        def _():
            accumulate(xb, xb)

        @pl.when(row_off + tile_rows > rows)       # ragged last block / overshoot
        def _():
            rid = lax.broadcasted_iota(jnp.int32, (tile_rows, 1), 0) + row_off
            valid = rid < rows
            accumulate(jnp.where(valid, xb, pos), jnp.where(valid, xb, neg))

    return kernel


def pallas_min_max(x, *, tile_rows=None, force_kernel=False):
    """Global (min, max) of x, computed with a tiled Pallas TPU reduction."""
    if x.size == 0:
        raise ValueError("CheckRange: empty input has no min/max")

    flat = x.reshape(-1)                   # contiguous -> free bitcast in XLA
    n = flat.shape[0]
    itemsize = jnp.dtype(x.dtype).itemsize
    rdtype = _reduce_dtype(x.dtype)

    small = (n * itemsize) < _SMALL_BYTES
    ragged_lanes = (n % _LANE) != 0
    unsupported = itemsize > 4 or jnp.issubdtype(x.dtype, jnp.bool_)
    if (small and not force_kernel) or ragged_lanes or unsupported:
        # Tiny tensors: launch/pipeline overhead beats the work.  Ragged lane
        # counts: re-laning would force an HBM copy; XLA's fused single-pass
        # reduction is already ~roofline, so just use it.
        return jnp.min(flat).astype(rdtype), jnp.max(flat).astype(rdtype)

    rows = n // _LANE
    x2 = flat.reshape(rows, _LANE)         # still a free bitcast

    if tile_rows is None:
        tile_rows = min(_TILE_BYTES // (_LANE * itemsize), _MAX_TILE_ROWS)
    tile_rows = max(_SUB, (tile_rows // _SUB) * _SUB)
    tile_rows = min(tile_rows, -(-rows // _SUB) * _SUB)

    total_blocks = -(-rows // tile_rows)
    num_slices = 2 if total_blocks >= 2 else 1     # v7x: 2 TCs; neutral elsewhere
    blocks_per_slice = -(-total_blocks // num_slices)

    pos, neg = _sentinels(rdtype)
    kernel = _make_minmax_kernel(rows, tile_rows, blocks_per_slice, rdtype, pos, neg)

    def in_map(s, k):
        # Clamp overshoot steps of the parallel split onto the last real block;
        # those steps are fully masked in-kernel, and min/max are idempotent.
        return (jnp.minimum(s * blocks_per_slice + k, total_blocks - 1), 0)

    mn_parts, mx_parts = pl.pallas_call(
        kernel,
        out_shape=(jax.ShapeDtypeStruct((num_slices, _SUB, _LANE), rdtype),
                   jax.ShapeDtypeStruct((num_slices, _SUB, _LANE), rdtype)),
        grid_spec=pltpu.PrefetchScalarGridSpec(
            num_scalar_prefetch=0,
            grid=(num_slices, blocks_per_slice),
            in_specs=[pl.BlockSpec((tile_rows, _LANE), in_map)],
            out_specs=[pl.BlockSpec((1, _SUB, _LANE), lambda s, k: (s, 0, 0)),
                       pl.BlockSpec((1, _SUB, _LANE), lambda s, k: (s, 0, 0))]),
        compiler_params=pltpu.CompilerParams(
            dimension_semantics=("parallel", "arbitrary"),
            vmem_limit_bytes=_VMEM_LIMIT),
        cost_estimate=pl.CostEstimate(
            flops=2 * n, transcendentals=0, bytes_accessed=n * itemsize),
    )(x2)

    # Tiny final combine across slices/sublanes/lanes (<= 2*8*128 elements).
    return jnp.min(mn_parts), jnp.max(mx_parts)


class CheckRange:
    """Pallas/JAX equivalent of torchmore CheckRange: values must lie in [lo, hi]."""

    def __init__(self, lo=-100000.0, hi=100000.0, name=''):
        self.valid = (lo, hi)
        self.name = name

    def __call__(self, x):
        return self.forward(x)

    def forward(self, x):
        mn, mx = pallas_min_max(x)
        mn_f = float(mn)   # host sync, mirrors torch's x.min().item()
        mx_f = float(mx)
        assert mn_f >= self.valid[0], (self.name, mn_f, self.valid)
        assert mx_f <= self.valid[1], (self.name, mx_f, self.valid)
        return x           # identity pass-through, no copy

    def __repr__(self):
        return 'CheckRange({}, {}, name="{}")'.format(
            self.valid[0], self.valid[1], self.name)


if __name__ == "__main__":
    key = jax.random.PRNGKey(0)
    k1, k2, k3 = jax.random.split(key, 3)

    # 1) Module demo at the spec's small NCHW shape (fast path, identity check).
    x = jax.random.normal(k1, (2, 4, 16, 16), dtype=jnp.float32)
    module = CheckRange(-100000.0, 100000.0, name="demo")
    y = jax.block_until_ready(module(x))
    assert y.shape == x.shape and y.dtype == x.dtype
    assert bool(jnp.array_equal(y, x)), "CheckRange must return x unchanged"

    # 2) Kernel path: multi-block reduction + 2-way parallel slice split.
    x_big = jax.random.normal(k2, (8, 16, 64, 64), dtype=jnp.float32)   # 2 MiB
    mn, mx = jax.block_until_ready(
        pallas_min_max(x_big, tile_rows=512, force_kernel=True))
    assert float(mn) == float(jnp.min(x_big)), (float(mn), float(jnp.min(x_big)))
    assert float(mx) == float(jnp.max(x_big)), (float(mx), float(jnp.max(x_big)))

    # 3) Kernel path with a ragged last row-block (rows % tile_rows != 0).
    x_ragged = jax.random.normal(k3, (5, 8, 64, 32), dtype=jnp.float32)
    mn, mx = jax.block_until_ready(
        pallas_min_max(x_ragged, tile_rows=512, force_kernel=True))
    assert float(mn) == float(jnp.min(x_ragged))
    assert float(mx) == float(jnp.max(x_ragged))

    # 4) Integer dtype + an overshoot block on the second parallel slice.
    x_int = jax.random.randint(k1, (3, 16, 64, 64), -1000, 1000, dtype=jnp.int32)
    mn, mx = jax.block_until_ready(
        pallas_min_max(x_int, tile_rows=512, force_kernel=True))
    assert int(mn) == int(jnp.min(x_int)) and int(mx) == int(jnp.max(x_int))

    # 5) Module on a kernel-sized input with default tiling (identity + check).
    y2 = jax.block_until_ready(CheckRange(name="big")(x_big))
    assert bool(jnp.array_equal(y2, x_big))

    # Out-of-range input must trip the check (mirrors the torch asserts).
    tripped = False
    try:
        CheckRange(-1.0, 1.0, name="trip")(x_big * 1e7)
    except AssertionError:
        tripped = True
    assert tripped, "CheckRange failed to flag out-of-range values"

    print("KERNEL_OK")
</pallas_src>

<mosaic_0001>
module attributes {stable_mosaic.version = 11 : i64} {
  func.func @kernel(%arg0: i32, %arg1: i32, %arg2: memref<512x128xf32, #tpu.memory_space<vmem>>, %arg3: memref<1x8x128xf32, #tpu.memory_space<vmem>>, %arg4: memref<1x8x128xf32, #tpu.memory_space<vmem>>) attributes {dimension_semantics = [#tpu.dimension_semantics<parallel>, #tpu.dimension_semantics<arbitrary>], iteration_bounds = array<i64: 2, 4>, scalar_prefetch = 0 : i64, scratch_operands = 0 : i64, tpu.core_type = #tpu.core_type<tc>, window_params = [{transform_indices = @transform_0, window_bounds = array<i64: 512, 128>}, {transform_indices = @transform_1, window_bounds = array<i64: 1, 8, 128>}, {transform_indices = @transform_2, window_bounds = array<i64: 1, 8, 128>}]} {
    %c0_i32 = arith.constant 0 : i32
    %0 = arith.cmpi eq, %arg1, %c0_i32 : i32
    %1 = arith.extui %0 : i1 to i32
    %c0_i32_0 = arith.constant 0 : i32
    %2 = arith.cmpi ne, %1, %c0_i32_0 : i32
    scf.if %2 {
      %cst = arith.constant 0x7F800000 : f32
      %15 = vector.broadcast %cst : f32 to vector<1x8x128xf32>
      %c0_7 = arith.constant 0 : index
      %c0_8 = arith.constant 0 : index
      %c0_9 = arith.constant 0 : index
      %16 = vector.load %arg3[%c0_7, %c0_8, %c0_9] : memref<1x8x128xf32, #tpu.memory_space<vmem>>, vector<1x8x128xf32>
      tpu.vector_store %arg3[%c0_7, %c0_8, %c0_9], %15 {strides = array<i32>} : memref<1x8x128xf32, #tpu.memory_space<vmem>>, vector<1x8x128xf32>,
      %cst_10 = arith.constant 0xFF800000 : f32
      %17 = vector.broadcast %cst_10 : f32 to vector<1x8x128xf32>
      %c0_11 = arith.constant 0 : index
      %c0_12 = arith.constant 0 : index
      %c0_13 = arith.constant 0 : index
      %18 = vector.load %arg4[%c0_11, %c0_12, %c0_13] : memref<1x8x128xf32, #tpu.memory_space<vmem>>, vector<1x8x128xf32>
      tpu.vector_store %arg4[%c0_11, %c0_12, %c0_13], %17 {strides = array<i32>} : memref<1x8x128xf32, #tpu.memory_space<vmem>>, vector<1x8x128xf32>,
    } else {
    }
    %c4_i32 = arith.constant 4 : i32
    %3 = arith.muli %arg0, %c4_i32 : i32
    %4 = arith.addi %3, %arg1 : i32
    %c512_i32 = arith.constant 512 : i32
    %5 = arith.muli %4, %c512_i32 : i32
    %c0 = arith.constant 0 : index
    %c0_1 = arith.constant 0 : index
    %6 = vector.load %arg2[%c0, %c0_1] : memref<512x128xf32, #tpu.memory_space<vmem>>, vector<512x128xf32>
    %c512_i32_2 = arith.constant 512 : i32
    %7 = arith.addi %5, %c512_i32_2 : i32
    %c4096_i32 = arith.constant 4096 : i32
    %8 = arith.cmpi sle, %7, %c4096_i32 : i32
    %9 = arith.extui %8 : i1 to i32
    %c0_i32_3 = arith.constant 0 : i32
    %10 = arith.cmpi ne, %9, %c0_i32_3 : i32
    scf.if %10 {
      %c0_7 = arith.constant 0 : index
      %c0_8 = arith.constant 0 : index
      %c0_9 = arith.constant 0 : index
      %15 = vector.load %arg3[%c0_7, %c0_8, %c0_9] : memref<1x8x128xf32, #tpu.memory_space<vmem>>, vector<1x8x128xf32>
      %16 = vector.shape_cast %6 : vector<512x128xf32> to vector<64x8x128xf32>
      %cst = arith.constant dense<0x7F800000> : vector<8x128xf32>
      %17 = vector.multi_reduction <minimumf>, %16, %cst [0] : vector<64x8x128xf32> to vector<8x128xf32>
      %18 = vector.shape_cast %17 : vector<8x128xf32> to vector<1x8x128xf32>
      %19 = arith.minimumf %15, %18 : vector<1x8x128xf32>
      %c0_10 = arith.constant 0 : index
      %c0_11 = arith.constant 0 : index
      %c0_12 = arith.constant 0 : index
      %20 = vector.load %arg3[%c0_10, %c0_11, %c0_12] : memref<1x8x128xf32, #tpu.memory_space<vmem>>, vector<1x8x128xf32>
      tpu.vector_store %arg3[%c0_10, %c0_11, %c0_12], %19 {strides = array<i32>} : memref<1x8x128xf32, #tpu.memory_space<vmem>>, vector<1x8x128xf32>,
      %c0_13 = arith.constant 0 : index
      %c0_14 = arith.constant 0 : index
      %c0_15 = arith.constant 0 : index
      %21 = vector.load %arg4[%c0_13, %c0_14, %c0_15] : memref<1x8x128xf32, #tpu.memory_space<vmem>>, vector<1x8x128xf32>
      %22 = vector.shape_cast %6 : vector<512x128xf32> to vector<64x8x128xf32>
      %cst_16 = arith.constant dense<0xFF800000> : vector<8x128xf32>
      %23 = vector.multi_reduction <maximumf>, %22, %cst_16 [0] : vector<64x8x128xf32> to vector<8x128xf32>
      %24 = vector.shape_cast %23 : vector<8x128xf32> to vector<1x8x128xf32>
      %25 = arith.maximumf %21, %24 : vector<1x8x128xf32>
      %c0_17 = arith.constant 0 : index
      %c0_18 = arith.constant 0 : index
      %c0_19 = arith.constant 0 : index
      %26 = vector.load %arg4[%c0_17, %c0_18, %c0_19] : memref<1x8x128xf32, #tpu.memory_space<vmem>>, vector<1x8x128xf32>
      tpu.vector_store %arg4[%c0_17, %c0_18, %c0_19], %25 {strides = array<i32>} : memref<1x8x128xf32, #tpu.memory_space<vmem>>, vector<1x8x128xf32>,
    } else {
    }
    %c512_i32_4 = arith.constant 512 : i32
    %11 = arith.addi %5, %c512_i32_4 : i32
    %c4096_i32_5 = arith.constant 4096 : i32
    %12 = arith.cmpi sgt, %11, %c4096_i32_5 : i32
    %13 = arith.extui %12 : i1 to i32
    %c0_i32_6 = arith.constant 0 : i32
    %14 = arith.cmpi ne, %13, %c0_i32_6 : i32
    scf.if %14 {
      %15 = tpu.iota {dimensions = array<i32: 0>} : vector<512x1xi32>
      %16 = vector.broadcast %5 : i32 to vector<512x1xi32>
      %17 = arith.addi %15, %16 : vector<512x1xi32>
      %c4096_i32_7 = arith.constant 4096 : i32
      %18 = vector.broadcast %c4096_i32_7 : i32 to vector<512x1xi32>
      %19 = arith.cmpi slt, %17, %18 : vector<512x1xi32>
      %cst = arith.constant 0x7F800000 : f32
      %20 = vector.shape_cast %19 : vector<512x1xi1> to vector<512x1xi1>
      %21 = vector.broadcast %20 : vector<512x1xi1> to vector<512x128xi1>
      %22 = vector.broadcast %cst : f32 to vector<512x128xf32>
      %23 = arith.select %21, %6, %22 : vector<512x128xi1>, vector<512x128xf32>
      %cst_8 = arith.constant 0xFF800000 : f32
      %24 = vector.shape_cast %19 : vector<512x1xi1> to vector<512x1xi1>
      %25 = vector.broadcast %24 : vector<512x1xi1> to vector<512x128xi1>
      %26 = vector.broadcast %cst_8 : f32 to vector<512x128xf32>
      %27 = arith.select %25, %6, %26 : vector<512x128xi1>, vector<512x128xf32>
      %c0_9 = arith.constant 0 : index
      %c0_10 = arith.constant 0 : index
      %c0_11 = arith.constant 0 : index
      %28 = vector.load %arg3[%c0_9, %c0_10, %c0_11] : memref<1x8x128xf32, #tpu.memory_space<vmem>>, vector<1x8x128xf32>
      %29 = vector.shape_cast %23 : vector<512x128xf32> to vector<64x8x128xf32>
      %cst_12 = arith.constant dense<0x7F800000> : vector<8x128xf32>
      %30 = vector.multi_reduction <minimumf>, %29, %cst_12 [0] : vector<64x8x128xf32> to vector<8x128xf32>
      %31 = vector.shape_cast %30 : vector<8x128xf32> to vector<1x8x128xf32>
      %32 = arith.minimumf %28, %31 : vector<1x8x128xf32>
      %c0_13 = arith.constant 0 : index
      %c0_14 = arith.constant 0 : index
      %c0_15 = arith.constant 0 : index
      %33 = vector.load %arg3[%c0_13, %c0_14, %c0_15] : memref<1x8x128xf32, #tpu.memory_space<vmem>>, vector<1x8x128xf32>
      tpu.vector_store %arg3[%c0_13, %c0_14, %c0_15], %32 {strides = array<i32>} : memref<1x8x128xf32, #tpu.memory_space<vmem>>, vector<1x8x128xf32>,
      %c0_16 = arith.constant 0 : index
      %c0_17 = arith.constant 0 : index
      %c0_18 = arith.constant 0 : index
      %34 = vector.load %arg4[%c0_16, %c0_17, %c0_18] : memref<1x8x128xf32, #tpu.memory_space<vmem>>, vector<1x8x128xf32>
      %35 = vector.shape_cast %27 : vector<512x128xf32> to vector<64x8x128xf32>
      %cst_19 = arith.constant dense<0xFF800000> : vector<8x128xf32>
      %36 = vector.multi_reduction <maximumf>, %35, %cst_19 [0] : vector<64x8x128xf32> to vector<8x128xf32>
      %37 = vector.shape_cast %36 : vector<8x128xf32> to vector<1x8x128xf32>
      %38 = arith.maximumf %34, %37 : vector<1x8x128xf32>
      %c0_20 = arith.constant 0 : index
      %c0_21 = arith.constant 0 : index
      %c0_22 = arith.constant 0 : index
      %39 = vector.load %arg4[%c0_20, %c0_21, %c0_22] : memref<1x8x128xf32, #tpu.memory_space<vmem>>, vector<1x8x128xf32>
      tpu.vector_store %arg4[%c0_20, %c0_21, %c0_22], %38 {strides = array<i32>} : memref<1x8x128xf32, #tpu.memory_space<vmem>>, vector<1x8x128xf32>,
    } else {
    }
    return
  }
  func.func @transform_0(%arg0: i32, %arg1: i32) -> (i32, i32) {
    %c4_i32 = arith.constant 4 : i32
    %0 = arith.muli %arg0, %c4_i32 : i32
    %1 = arith.addi %0, %arg1 : i32
    %c7_i32 = arith.constant 7 : i32
    %2 = arith.minsi %1, %c7_i32 : i32
    %c0_i32 = arith.constant 0 : i32
    %c0_i32_0 = arith.constant 0 : i32
    return %2, %c0_i32 : i32, i32
  }
  func.func @transform_1(%arg0: i32, %arg1: i32) -> (i32, i32, i32) {
    %c0_i32 = arith.constant 0 : i32
    %c0_i32_0 = arith.constant 0 : i32
    %c0_i32_1 = arith.constant 0 : i32
    return %arg0, %c0_i32, %c0_i32_0 : i32, i32, i32
  }
  func.func @transform_2(%arg0: i32, %arg1: i32) -> (i32, i32, i32) {
    %c0_i32 = arith.constant 0 : i32
    %c0_i32_0 = arith.constant 0 : i32
    %c0_i32_1 = arith.constant 0 : i32
    return %arg0, %c0_i32, %c0_i32_0 : i32, i32, i32
  }
}

</mosaic_0001>

<bundles_post_ra>
// kernel: tpu_custom_call.1
= control target key start
LH: loop header
LB: loop body
LE: loop exit
PB: predicated region body
PF: predicated region fallthrough
CT: control target
= control target key end

     0   :  { %8 = vsyncpa [#allocation3], 0  ;;  %s2832_s0 = inlined_call_operand.hbm [shape: f32[4096,128], index: 0, kind: input, shape index: {}]   ;;  %s2833_s1 = inlined_call_operand.hbm [shape: f32[2,8,128], index: 1, kind: output, shape index: {0}]   ;;  %s2834_s2 = inlined_call_operand.hbm [shape: f32[2,8,128], index: 2, kind: output, shape index: {1}]  }
   0x1   :  { %10 = vsyncpa [#allocation3 + $0x1], 0 }
   0x2   :  { %11 = vsyncpa [#allocation4], 0 }
   0x3   :  { %13 = vsyncpa [#allocation4 + $0x1], 0 }
   0x4   :  { %14 = vsyncpa [#allocation7], 0 }
   0x5   :  { %16 = vsyncpa [#allocation7 + $0x1], 0  ;;  %s1482_s9 = smov 0   ;;  %s1484_s10 = smov 0  }
   0x6   :  { %s1486_s11 = smov 0   ;;  %s1488_s12 = smov 0  }
   0x7   :  { %s1490_s13 = smov 0   ;;  %s1492_s14 = smov 0  }
   0x8   :  { %s1494_s15 = smov 0   ;;  %s1496_s16 = smov 0  }
   0x9   :  { %s1498_s17 = smov 0   ;;  %s1500_s18 = smov 0  }
   0xa   :  { %s1502_s19 = smov 0  }
   0xb LB: > { %2961 = sst [smem:[#allocation11_spill]] %s1454_s18  ;;  %s1143_s20 = sadd.s32 4294967295, %s1458_s19   ;;  %s1458_s19 = sphi %s1502_s19, %s22_s19   ;;  %s1454_s18 = sphi %s1500_s18, %s3150_s18   ;;  %s1450_s17 = sphi %s1498_s17, %s3158_s17   ;;  %s1446_s16 = sphi %s1496_s16, %s3148_s16   ;;  %s1442_s15 = sphi %s1494_s15, %s3157_s15   ;;  %s1438_s14 = sphi %s1492_s14, %s3156_s14   ;;  %s1434_s13 = sphi %s1490_s13, %s3155_s13   ;;  %s1430_s12 = sphi %s1488_s12, %s3154_s12   ;;  %s1426_s11 = sphi %s1486_s11, %s3153_s11   ;;  %s1422_s10 = sphi %s1484_s10, %s3152_s10   ;;  %s1418_s9 = sphi %s1482_s9, %s3151_s9  }
   0xc   : > { %s1144_s21 = sadd.s32 4294967294, %s1458_s19   ;;  %s31_s22 = sadd.s32 1, %s1450_s17 }
   0xd   : > { %s34_s23 = sadd.s32 1, %s1454_s18  ;;  %p32_p0 = scmp.ge.s32.totalorder %s31_s22, 4 }
   0xe   : > { %s1145_s24 = sshll.u32 %s1454_s18, 2  ;;  %s49_s26 = sadd.s32 1, %s1438_s14 }
   0xf   : > { %s39_s25 = sadd.s32 %s1450_s17, %s1145_s24  ;;  %s3160_s22 = smov (%p32_p0, %s31_s22), 0 }
  0x10   : > { %2962 = sst [smem:[#allocation12_spill]] %s3160_s22  ;;  %s3162_s23 = smov (!%p32_p0, %s34_s23), %s1454_s18 }
  0x11   : > { %p40_p1 = scmp.lt.s32.totalorder %s39_s25, 7  ;;  %p56_p2 = scmp.ne.s32.totalorder %s1438_s14, %s1434_s13 }
  0x12   : > { %p36_p3 = scmp.ge.s32.totalorder %s3162_s23, 2  ;;  %p57_p4 = scmp.eq.s32.totalorder %s1458_s19, 0 }
  0x13   : > { %s3164_s25 = smov (!%p40_p1, %s39_s25), 7  ;;  %p62_p6 = scmp.ne.s32.totalorder %s1434_s13, %s1430_s12 }
  0x14   : > { %s3166_s23 = smov (%p36_p3, %s3162_s23), 0  ;;  %p1552_p5 = por %p57_p4, %p56_p2 }
  0x15   : > { %2963 = sst [smem:[#allocation13_spill]] %s3166_s23  ;;  %s1146_s28 = sshll.u32 %s3166_s23, 2 }
  0x16   : > { %p63_p7 = scmp.eq.s32.totalorder %s1143_s20, 0  ;;  %s43_s29 = sadd.s32 %s1146_s28, %s3160_s22 }
  0x17   : > { %s72_s30 = ssub.s32 %s1454_s18, %s3166_s23  ;;  %p44_p8 = scmp.lt.s32.totalorder %s43_s29, 7 }
  0x18   : > { %p1564_p9 = por %p63_p7, %p62_p6  ;;  %p73_p10 = scmp.eq.s32.totalorder %s72_s30, 0 }
  0x19   : > { %s75_s4 = sadd.s32 1, %s1426_s11  ;;  %s3168_s29 = smov (!%p44_p8, %s43_s29), 7 }
  0x1a   : > { %s1570_s5 = scalar_select %p73_p10, %s1426_s11, %s75_s4  }
  0x1b   : > { %s46_s6 = ssub.s32 %s3164_s25, %s3168_s29  ;;  %p85_p11 = scmp.ne.s32.totalorder %s1426_s11, %s1422_s10 }
  0x1c   : > { %p47_p12 = scmp.eq.s32.totalorder %s46_s6, 0  ;;  %p86_p13 = scmp.eq.s32.totalorder %s1143_s20, 7 }
  0x1d   : > { %p91_p0 = scmp.ne.s32.totalorder %s1422_s10, %s1418_s9  ;;  %p92_p1 = scmp.eq.s32.totalorder %s1144_s21, 7 }
  0x1e   : > { %s1581_s7 = scalar_select %p47_p12, %s1438_s14, %s49_s26  }
  0x1f   : > { %p1583_p2 = por %p86_p13, %p85_p11  ;;  %p1587_p3 = por %p92_p1, %p91_p0 }
  0x20   : > { %p1186_p4 = scmp.lt.s32.totalorder %s1458_s19, 8  ;;  %s138_s24 = sand.u32 1, %s1438_s14  }
  0x21   : > { %s1168_s28 = sshll.u32 %s3164_s25, 13  ;;  %s1149_s29 = sshll.u32 %s138_s24, 9 }
  0x22   : > { %s152_s20 = scalar_lea.hbm %s2832_s0, %s1168_s28  ;;  %s142_s6 = scalar_lea.vmem [#allocation2], %s1149_s29 }
  0x23   : > { %s153_s21 = sshll.u32 %s142_s6, 4  ;;  %p1598_p6 = pnand %p1186_p4, %p1552_p5  ;;  %s154_s21 = int_to_ptr.vmem [resolvable:$true] %s153_s21 }
  0x24   : > { %s139_s23 = scalar_lea.sflag [#allocation3], %s138_s24  ;;  %s1293_s22 = scalar_lea.vmem %s154_s21, 8192 }
  0x25   : > { %p1282_p7 = pneg %p1598_p6  ;;  %p1294_p8 = scmp.ne.s32.totalorder %s154_s21, %s1293_s22 }
  0x26   : > { %s1460_s25 = smov [#allocation2]  }
  0x27   : > { %p1296_p10 = pnand %p1294_p8, %p1282_p7  ;;  %s1298_s18 = sshll.u32 %s1460_s25, 4  ;;  %s1299_s18 = int_to_ptr.vmem [resolvable:$false] %s1298_s18 }
  0x28   : > { %s1300_s28 = scalar_lea.vmem %s1299_s18, 16384  ;;  %p1301_p12 = scmp.lt.s32.totalorder %s154_s21, %s1299_s18 }
  0x29   : > { %p1297_p11 = pneg %p1296_p10  ;;  %p1302_p13 = scmp.lt.s32.totalorder %s1300_s28, %s1293_s22 }
  0x2b   : > { %p1303_p0 = por %p1302_p13, %p1301_p12 }
  0x2d   : > { %p1304_p5 = pnand %p1303_p0, %p1297_p11 }
  0x2f   : > { %1307 = shalt.err (!%p1304_p5)
}
  0x30   : > { %s1461_s27 = smov 128   ;;  %s1462_s24 = smov 8  }
  0x31   : > { %1178 = dma.hbm_to_vmem [thread:$0]  (!%p1598_p6), %s152_s20, 8192, %s154_s21, %s139_s23, %s1461_s27, %s1461_s27, %s1462_s24  }
  0x32   : > { %p1153_p1 = scmp.ge.s32.totalorder %s1458_s19, 1  ;;  %p161_p4 = scmp.lt.s32.totalorder %s1458_s19, 9 }
  0x34   : > { %p162_p7 = pnand %p1153_p1, %p161_p4 }
  0x36   : > { %165 = sbr.rel (%p162_p7) target bundleno = 359 (0x167), region = 24 }
  0x3b   : > { %s167_s29 = sand.u32 1, %s1434_s13  }
  0x3c   : > { %s1154_s30 = sshll.u32 %s167_s29, 9  ;;  %s168_s18 = scalar_lea.sflag [#allocation3], %s167_s29 }
  0x3d   : > { %s1609_s22 = scalar_lea.vmem [#allocation2], %s1154_s30 }
  0x3e   : > { %1405 = dma.done.wait (%p1564_p9), %s168_s18, 8192  }
  0x3f   : > { %1407 = vsyncadd (%p1564_p9), %s168_s18, 4294959104  ;;  %s1616_s4 = sand.u32 1, %s1422_s10   ;;  %p1157_p6 = scmp.ne.s32.totalorder %s1442_s15, 0 }
  0x40   : > { %s1155_s23 = sshll.u32 %s1616_s4, 3 }
  0x41   : > { %s1619_s20 = scalar_lea.vmem [#allocation5], %s1155_s23  ;;  %s1621_s6 = scalar_lea.vmem [#allocation6], %s1155_s23 }
  0x42   : > { %205 = sbr.rel (%p1157_p6) target bundleno = 73 (0x49), region = 32 }
  0x47   : > { %v1463_v0 = vmov inf   ;;  %v1464_v1 = vmov -inf  }
  0x48   : > { %206 = vst [vmem:[%s1619_s20] sm:$0xff] %v1463_v0  ;;  %207 = vst [vmem:[%s1621_s6] sm:$0xff] %v1464_v1 }
  0x49 PF: > { %s1158_s3 = sshll.u32 %s1446_s16, 2  ;;  %v1628_v2 = vld [vmem:[%s1609_s22] sm:$0xff]  ;;  %v1631_v3 = vld [vmem:[%s1609_s22 + $0x8] sm:$0xff]  ;;  %v1634_v4 = vld [vmem:[%s1609_s22 + $0x10] sm:$0xff] }
  0x4a   : > { %2969 = vst [vmem:[#allocation14_spill] sm:$0xff] %v1631_v3  ;;  %s1637_s21 = sadd.s32 %s1442_s15, %s1158_s3  ;;  %v1640_v5 = vld [vmem:[%s1609_s22 + $0x18] sm:$0xff]  ;;  %v1643_v6 = vld [vmem:[%s1609_s22 + $0x20] sm:$0xff]  ;;  %v1646_v7 = vld [vmem:[%s1609_s22 + $0x28] sm:$0xff] }
  0x4b   : > { %2970 = vst [vmem:[#allocation15_spill] sm:$0xff] %v1643_v6  ;;  %2971 = vst [vmem:[#allocation16_spill] sm:$0xff] %v1646_v7  ;;  %s1159_s26 = sshll.u32 %s1637_s21, 9  ;;  %v1650_v8 = vld [vmem:[%s1609_s22 + $0x30] sm:$0xff]  ;;  %v1653_v9 = vld [vmem:[%s1609_s22 + $0x38] sm:$0xff] }
  0x4c   : > { %2972 = vst [vmem:[#allocation17_spill] sm:$0xff] %v1650_v8  ;;  %2973 = vst [vmem:[#allocation18_spill] sm:$0xff] %v1653_v9  ;;  %v1656_v10 = vld [vmem:[%s1609_s22 + $0x40] sm:$0xff]  ;;  %v1659_v11 = vld [vmem:[%s1609_s22 + $0x48] sm:$0xff]  ;;  %s1669_s15 = sadd.s32 512, %s1159_s26 }
  0x4d   : > { %v1662_v12 = vld [vmem:[%s1609_s22 + $0x50] sm:$0xff]  ;;  %v1665_v13 = vld [vmem:[%s1609_s22 + $0x58] sm:$0xff]  ;;  %v1672_v14 = vld [vmem:[%s1609_s22 + $0x60] sm:$0xff]  ;;  %p1160_p9 = scmp.gt.s32.totalorder %s1669_s15, 4096 }
  0x4e   : > { %v1675_v15 = vld [vmem:[%s1609_s22 + $0x68] sm:$0xff]  ;;  %v1678_v16 = vld [vmem:[%s1609_s22 + $0x70] sm:$0xff]  ;;  %v1681_v17 = vld [vmem:[%s1609_s22 + $0x78] sm:$0xff] }
  0x4f   : > { %v1684_v18 = vld [vmem:[%s1609_s22 + $0x80] sm:$0xff]  ;;  %v1687_v19 = vld [vmem:[%s1609_s22 + $0x88] sm:$0xff]  ;;  %v1690_v20 = vld [vmem:[%s1609_s22 + $0x90] sm:$0xff] }
  0x50   : > { %v1693_v21 = vld [vmem:[%s1609_s22 + $0x98] sm:$0xff]  ;;  %v1696_v22 = vld [vmem:[%s1609_s22 + $0xa0] sm:$0xff]  ;;  %v1699_v23 = vld [vmem:[%s1609_s22 + $0xa8] sm:$0xff] }
  0x51   : > { %v1702_v24 = vld [vmem:[%s1609_s22 + $0xb0] sm:$0xff]  ;;  %v1705_v25 = vld [vmem:[%s1609_s22 + $0xb8] sm:$0xff]  ;;  %v1708_v26 = vld [vmem:[%s1609_s22 + $0xc0] sm:$0xff] }
  0x52   : > { %2974 = vst [vmem:[#allocation19_spill] sm:$0xff] %v1708_v26  ;;  %v1711_v27 = vld [vmem:[%s1609_s22 + $0xc8] sm:$0xff]  ;;  %v1714_v28 = vld [vmem:[%s1609_s22 + $0xd0] sm:$0xff]  ;;  %v1717_v29 = vld [vmem:[%s1609_s22 + $0xd8] sm:$0xff] }
  0x53   : > { %2975 = vst [vmem:[#allocation20_spill] sm:$0xff] %v1711_v27  ;;  %2976 = vst [vmem:[#allocation21_spill] sm:$0xff] %v1714_v28  ;;  %v1720_v30 = vld [vmem:[%s1609_s22 + $0xe0] sm:$0xff]  ;;  %v1723_v31 = vld [vmem:[%s1609_s22 + $0xe8] sm:$0xff] }
  0x54   : > { %2977 = vst [vmem:[#allocation22_spill] sm:$0xff] %v1717_v29  ;;  %2978 = vst [vmem:[#allocation23_spill] sm:$0xff] %v1720_v30  ;;  %v1726_v32 = vld [vmem:[%s1609_s22 + $0xf0] sm:$0xff]  ;;  %v1729_v33 = vld [vmem:[%s1609_s22 + $0xf8] sm:$0xff] }
  0x55   : > { %2979 = vst [vmem:[#allocation24_spill] sm:$0xff] %v1723_v31  ;;  %2980 = vst [vmem:[#allocation25_spill] sm:$0xff] %v1726_v32  ;;  %v1732_v34 = vld [vmem:[%s1609_s22 + $0x100] sm:$0xff]  ;;  %v1735_v35 = vld [vmem:[%s1609_s22 + $0x108] sm:$0xff] }
  0x56   : > { %2981 = vst [vmem:[#allocation26_spill] sm:$0xff] %v1729_v33  ;;  %2982 = vst [vmem:[#allocation27_spill] sm:$0xff] %v1732_v34  ;;  %v1738_v36 = vld [vmem:[%s1609_s22 + $0x110] sm:$0xff]  ;;  %v1741_v37 = vld [vmem:[%s1609_s22 + $0x118] sm:$0xff] }
  0x57   : > { %2983 = vst [vmem:[#allocation28_spill] sm:$0xff] %v1735_v35  ;;  %2984 = vst [vmem:[#allocation29_spill] sm:$0xff] %v1738_v36  ;;  %v1744_v38 = vld [vmem:[%s1609_s22 + $0x120] sm:$0xff]  ;;  %v1747_v39 = vld [vmem:[%s1609_s22 + $0x128] sm:$0xff] }
  0x58   : > { %2985 = vst [vmem:[#allocation30_spill] sm:$0xff] %v1741_v37  ;;  %2986 = vst [vmem:[#allocation31_spill] sm:$0xff] %v1744_v38  ;;  %v1750_v40 = vld [vmem:[%s1609_s22 + $0x130] sm:$0xff]  ;;  %v1753_v41 = vld [vmem:[%s1609_s22 + $0x138] sm:$0xff] }
  0x59   : > { %2987 = vst [vmem:[#allocation32_spill] sm:$0xff] %v1747_v39  ;;  %2988 = vst [vmem:[#allocation33_spill] sm:$0xff] %v1750_v40  ;;  %v1756_v42 = vld [vmem:[%s1609_s22 + $0x140] sm:$0xff]  ;;  %v1759_v43 = vld [vmem:[%s1609_s22 + $0x148] sm:$0xff] }
  0x5a   : > { %2989 = vst [vmem:[#allocation34_spill] sm:$0xff] %v1753_v41  ;;  %2990 = vst [vmem:[#allocation35_spill] sm:$0xff] %v1756_v42  ;;  %v1762_v44 = vld [vmem:[%s1609_s22 + $0x150] sm:$0xff]  ;;  %v1765_v45 = vld [vmem:[%s1609_s22 + $0x158] sm:$0xff] }
  0x5b   : > { %2991 = vst [vmem:[#allocation36_spill] sm:$0xff] %v1759_v43  ;;  %2992 = vst [vmem:[#allocation37_spill] sm:$0xff] %v1762_v44  ;;  %v1768_v46 = vld [vmem:[%s1609_s22 + $0x160] sm:$0xff]  ;;  %v1771_v47 = vld [vmem:[%s1609_s22 + $0x168] sm:$0xff] }
  0x5c   : > { %2993 = vst [vmem:[#allocation38_spill] sm:$0xff] %v1765_v45  ;;  %2994 = vst [vmem:[#allocation39_spill] sm:$0xff] %v1768_v46  ;;  %v1774_v48 = vld [vmem:[%s1609_s22 + $0x170] sm:$0xff]  ;;  %v1777_v49 = vld [vmem:[%s1609_s22 + $0x178] sm:$0xff] }
  0x5d   : > { %2995 = vst [vmem:[#allocation40_spill] sm:$0xff] %v1771_v47  ;;  %2996 = vst [vmem:[#allocation41_spill] sm:$0xff] %v1774_v48  ;;  %v1780_v50 = vld [vmem:[%s1609_s22 + $0x180] sm:$0xff]  ;;  %v1783_v51 = vld [vmem:[%s1609_s22 + $0x188] sm:$0xff] }
  0x5e   : > { %2997 = vst [vmem:[#allocation42_spill] sm:$0xff] %v1777_v49  ;;  %2998 = vst [vmem:[#allocation43_spill] sm:$0xff] %v1780_v50  ;;  %v1786_v52 = vld [vmem:[%s1609_s22 + $0x190] sm:$0xff]  ;;  %v1789_v53 = vld [vmem:[%s1609_s22 + $0x198] sm:$0xff] }
  0x5f   : > { %2999 = vst [vmem:[#allocation44_spill] sm:$0xff] %v1783_v51  ;;  %3000 = vst [vmem:[#allocation45_spill] sm:$0xff] %v1786_v52  ;;  %v1792_v54 = vld [vmem:[%s1609_s22 + $0x1a0] sm:$0xff]  ;;  %v1795_v55 = vld [vmem:[%s1609_s22 + $0x1a8] sm:$0xff] }
  0x60   : > { %3001 = vst [vmem:[#allocation46_spill] sm:$0xff] %v1789_v53  ;;  %3002 = vst [vmem:[#allocation47_spill] sm:$0xff] %v1792_v54  ;;  %v1798_v56 = vld [vmem:[%s1609_s22 + $0x1b0] sm:$0xff]  ;;  %v1801_v57 = vld [vmem:[%s1609_s22 + $0x1b8] sm:$0xff] }
  0x61   : > { %3003 = vst [vmem:[#allocation48_spill] sm:$0xff] %v1795_v55  ;;  %3004 = vst [vmem:[#allocation49_spill] sm:$0xff] %v1798_v56  ;;  %v1804_v58 = vld [vmem:[%s1609_s22 + $0x1c0] sm:$0xff]  ;;  %v1807_v59 = vld [vmem:[%s1609_s22 + $0x1c8] sm:$0xff] }
  0x62   : > { %3005 = vst [vmem:[#allocation50_spill] sm:$0xff] %v1801_v57  ;;  %3006 = vst [vmem:[#allocation51_spill] sm:$0xff] %v1804_v58  ;;  %v1810_v60 = vld [vmem:[%s1609_s22 + $0x1d0] sm:$0xff]  ;;  %v1813_v61 = vld [vmem:[%s1609_s22 + $0x1d8] sm:$0xff]  ;;  %279 = sbr.rel (%p1160_p9) target bundleno = 141 (0x8d), region = 36 }
  0x63   : > { %3007 = vst [vmem:[#allocation52_spill] sm:$0xff] %v1807_v59  ;;  %3008 = vst [vmem:[#allocation53_spill] sm:$0xff] %v1810_v60  ;;  %v1816_v62 = vld [vmem:[%s1609_s22 + $0x1e0] sm:$0xff]  ;;  %v1819_v63 = vld [vmem:[%s1609_s22 + $0x1e8] sm:$0xff] }
  0x64   : > { %3009 = vst [vmem:[#allocation54_spill] sm:$0xff] %v1813_v61  ;;  %3010 = vst [vmem:[#allocation55_spill] sm:$0xff] %v1816_v62  ;;  %v1822_v0 = vld [vmem:[%s1609_s22 + $0x1f0] sm:$0xff]  ;;  %v1825_v1 = vld [vmem:[%s1609_s22 + $0x1f8] sm:$0xff] }
  0x65   : > { %3011 = vst [vmem:[#allocation56_spill] sm:$0xff] %v1819_v63  ;;  %3012 = vst [vmem:[#allocation57_spill] sm:$0xff] %v1822_v0 }
  0x66   : > { %3013 = vst [vmem:[#allocation58_spill] sm:$0xff] %v1825_v1 }
  0x67   : > { %v281_v58 = vmin.f32 %v1628_v2, %v1643_v6  ;;  %v282_v59 = vmin.f32 %v1631_v3, %v1646_v7  ;;  %v283_v61 = vmin.f32 %v1634_v4, %v1650_v8  ;;  %v284_v62 = vmin.f32 %v1640_v5, %v1653_v9 }
  0x68   : > { %v347_v0 = vmax.f32 %v1628_v2, %v1643_v6  ;;  %v348_v1 = vmax.f32 %v1631_v3, %v1646_v7  ;;  %v349_v63 = vmax.f32 %v1634_v4, %v1650_v8  ;;  %v350_v60 = vmax.f32 %v1640_v5, %v1653_v9 }
  0x69   : > { %v285_v57 = vmin.f32 %v281_v58, %v1656_v10  ;;  %v286_v56 = vmin.f32 %v282_v59, %v1659_v11  ;;  %v287_v55 = vmin.f32 %v283_v61, %v1662_v12  ;;  %v288_v54 = vmin.f32 %v284_v62, %v1665_v13 }
  0x6a   : > { %v351_v53 = vmax.f32 %v347_v0, %v1656_v10  ;;  %v352_v6 = vmax.f32 %v348_v1, %v1659_v11  ;;  %v353_v7 = vmax.f32 %v349_v63, %v1662_v12  ;;  %v354_v3 = vmax.f32 %v350_v60, %v1665_v13 }
  0x6b   : > { %v289_v8 = vmin.f32 %v285_v57, %v1672_v14  ;;  %v290_v9 = vmin.f32 %v286_v56, %v1675_v15  ;;  %v291_v58 = vmin.f32 %v287_v55, %v1678_v16  ;;  %v292_v59 = vmin.f32 %v288_v54, %v1681_v17 }
  0x6c   : > { %v355_v61 = vmax.f32 %v351_v53, %v1672_v14  ;;  %v356_v62 = vmax.f32 %v352_v6, %v1675_v15  ;;  %v357_v0 = vmax.f32 %v353_v7, %v1678_v16  ;;  %v358_v1 = vmax.f32 %v354_v3, %v1681_v17 }
  0x6d   : > { %v293_v63 = vmin.f32 %v289_v8, %v1684_v18  ;;  %v294_v60 = vmin.f32 %v290_v9, %v1687_v19  ;;  %v295_v57 = vmin.f32 %v291_v58, %v1690_v20  ;;  %v296_v56 = vmin.f32 %v292_v59, %v1693_v21 }
  0x6e   : > { %v359_v55 = vmax.f32 %v355_v61, %v1684_v18  ;;  %v360_v54 = vmax.f32 %v356_v62, %v1687_v19  ;;  %v361_v53 = vmax.f32 %v357_v0, %v1690_v20  ;;  %v362_v6 = vmax.f32 %v358_v1, %v1693_v21 }
  0x6f   : > { %v297_v7 = vmin.f32 %v293_v63, %v1696_v22  ;;  %v298_v3 = vmin.f32 %v294_v60, %v1699_v23  ;;  %v299_v8 = vmin.f32 %v295_v57, %v1702_v24  ;;  %v300_v9 = vmin.f32 %v296_v56, %v1705_v25 }
  0x70   : > { %v363_v58 = vmax.f32 %v359_v55, %v1696_v22  ;;  %v364_v59 = vmax.f32 %v360_v54, %v1699_v23  ;;  %v365_v61 = vmax.f32 %v361_v53, %v1702_v24  ;;  %v366_v62 = vmax.f32 %v362_v6, %v1705_v25 }
  0x71   : > { %v301_v0 = vmin.f32 %v297_v7, %v1708_v26  ;;  %v302_v1 = vmin.f32 %v298_v3, %v1711_v27  ;;  %v303_v63 = vmin.f32 %v299_v8, %v1714_v28  ;;  %v304_v60 = vmin.f32 %v300_v9, %v1717_v29 }
  0x72   : > { %v367_v57 = vmax.f32 %v363_v58, %v1708_v26  ;;  %v368_v56 = vmax.f32 %v364_v59, %v1711_v27  ;;  %v369_v55 = vmax.f32 %v365_v61, %v1714_v28  ;;  %v370_v54 = vmax.f32 %v366_v62, %v1717_v29 }
  0x73   : > { %v305_v53 = vmin.f32 %v301_v0, %v1720_v30  ;;  %v306_v6 = vmin.f32 %v302_v1, %v1723_v31  ;;  %v307_v7 = vmin.f32 %v303_v63, %v1726_v32  ;;  %v308_v3 = vmin.f32 %v304_v60, %v1729_v33 }
  0x74   : > { %v371_v8 = vmax.f32 %v367_v57, %v1720_v30  ;;  %v372_v9 = vmax.f32 %v368_v56, %v1723_v31  ;;  %v373_v58 = vmax.f32 %v369_v55, %v1726_v32  ;;  %v374_v59 = vmax.f32 %v370_v54, %v1729_v33 }
  0x75   : > { %v309_v61 = vmin.f32 %v305_v53, %v1732_v34  ;;  %v310_v62 = vmin.f32 %v306_v6, %v1735_v35  ;;  %v311_v0 = vmin.f32 %v307_v7, %v1738_v36  ;;  %v312_v1 = vmin.f32 %v308_v3, %v1741_v37 }
  0x76   : > { %v375_v63 = vmax.f32 %v371_v8, %v1732_v34  ;;  %v376_v60 = vmax.f32 %v372_v9, %v1735_v35  ;;  %v377_v57 = vmax.f32 %v373_v58, %v1738_v36  ;;  %v378_v56 = vmax.f32 %v374_v59, %v1741_v37 }
  0x77   : > { %v313_v55 = vmin.f32 %v309_v61, %v1744_v38  ;;  %v314_v54 = vmin.f32 %v310_v62, %v1747_v39  ;;  %v315_v53 = vmin.f32 %v311_v0, %v1750_v40  ;;  %v316_v6 = vmin.f32 %v312_v1, %v1753_v41 }
  0x78   : > { %v379_v7 = vmax.f32 %v375_v63, %v1744_v38  ;;  %v380_v3 = vmax.f32 %v376_v60, %v1747_v39  ;;  %v381_v8 = vmax.f32 %v377_v57, %v1750_v40  ;;  %v382_v9 = vmax.f32 %v378_v56, %v1753_v41 }
  0x79   : > { %v317_v58 = vmin.f32 %v313_v55, %v1756_v42  ;;  %v318_v59 = vmin.f32 %v314_v54, %v1759_v43  ;;  %v319_v61 = vmin.f32 %v315_v53, %v1762_v44  ;;  %v320_v62 = vmin.f32 %v316_v6, %v1765_v45 }
  0x7a   : > { %v383_v0 = vmax.f32 %v379_v7, %v1756_v42  ;;  %v384_v1 = vmax.f32 %v380_v3, %v1759_v43  ;;  %v385_v63 = vmax.f32 %v381_v8, %v1762_v44  ;;  %v386_v60 = vmax.f32 %v382_v9, %v1765_v45  ;;  %v3014_v45 = vld [vmem:[#allocation46_spill] sm:$0xff] }
  0x7b   : > { %v321_v57 = vmin.f32 %v317_v58, %v1768_v46  ;;  %v322_v56 = vmin.f32 %v318_v59, %v1771_v47  ;;  %v323_v55 = vmin.f32 %v319_v61, %v1774_v48  ;;  %v324_v54 = vmin.f32 %v320_v62, %v1777_v49 }
  0x7c   : > { %v387_v53 = vmax.f32 %v383_v0, %v1768_v46  ;;  %v388_v6 = vmax.f32 %v384_v1, %v1771_v47  ;;  %v389_v7 = vmax.f32 %v385_v63, %v1774_v48  ;;  %v390_v3 = vmax.f32 %v386_v60, %v1777_v49  ;;  %v3015_v47 = vld [vmem:[#allocation47_spill] sm:$0xff]  ;;  %v3016_v48 = vld [vmem:[#allocation48_spill] sm:$0xff]  ;;  %v3017_v49 = vld [vmem:[#allocation49_spill] sm:$0xff] }
  0x7d   : > { %v325_v8 = vmin.f32 %v321_v57, %v1780_v50  ;;  %v326_v9 = vmin.f32 %v322_v56, %v1783_v51  ;;  %v327_v58 = vmin.f32 %v323_v55, %v1786_v52  ;;  %v328_v59 = vmin.f32 %v324_v54, %v3014_v45  ;;  %v3018_v46 = vld [vmem:[#allocation50_spill] sm:$0xff] }
  0x7e   : > { %v391_v61 = vmax.f32 %v387_v53, %v1780_v50  ;;  %v392_v62 = vmax.f32 %v388_v6, %v1783_v51  ;;  %v393_v0 = vmax.f32 %v389_v7, %v1786_v52  ;;  %v394_v1 = vmax.f32 %v390_v3, %v3014_v45  ;;  %v3019_v51 = vld [vmem:[#allocation51_spill] sm:$0xff]  ;;  %v3020_v52 = vld [vmem:[#allocation52_spill] sm:$0xff]  ;;  %v3021_v3 = vld [vmem:[#allocation53_spill] sm:$0xff] }
  0x7f   : > { %v329_v63 = vmin.f32 %v325_v8, %v3015_v47  ;;  %v330_v60 = vmin.f32 %v326_v9, %v3016_v48  ;;  %v331_v57 = vmin.f32 %v327_v58, %v3017_v49  ;;  %v332_v56 = vmin.f32 %v328_v59, %v3018_v46  ;;  %v3022_v50 = vld [vmem:[#allocation54_spill] sm:$0xff] }
  0x80   : > { %v395_v55 = vmax.f32 %v391_v61, %v3015_v47  ;;  %v396_v54 = vmax.f32 %v392_v62, %v3016_v48  ;;  %v397_v53 = vmax.f32 %v393_v0, %v3017_v49  ;;  %v398_v6 = vmax.f32 %v394_v1, %v3018_v46  ;;  %v3023_v49 = vld [vmem:[#allocation55_spill] sm:$0xff]  ;;  %v3024_v61 = vld [vmem:[#allocation56_spill] sm:$0xff]  ;;  %v3025_v0 = vld [vmem:[#allocation57_spill] sm:$0xff] }
  0x81   : > { %v333_v7 = vmin.f32 %v329_v63, %v3019_v51  ;;  %v334_v45 = vmin.f32 %v330_v60, %v3020_v52  ;;  %v335_v8 = vmin.f32 %v331_v57, %v3021_v3  ;;  %v336_v9 = vmin.f32 %v332_v56, %v3022_v50  ;;  %v3026_v63 = vld [vmem:[#allocation58_spill] sm:$0xff] }
  0x82   : > { %v399_v58 = vmax.f32 %v395_v55, %v3019_v51  ;;  %v400_v59 = vmax.f32 %v396_v54, %v3020_v52  ;;  %v401_v47 = vmax.f32 %v397_v53, %v3021_v3  ;;  %v402_v48 = vmax.f32 %v398_v6, %v3022_v50  ;;  %v280_v54 = vld [vmem:[%s1619_s20] sm:$0xff] }
  0x83   : > { %v337_v46 = vmin.f32 %v333_v7, %v3023_v49  ;;  %v338_v62 = vmin.f32 %v334_v45, %v3024_v61  ;;  %v339_v1 = vmin.f32 %v335_v8, %v3025_v0  ;;  %v340_v60 = vmin.f32 %v336_v9, %v3026_v63  ;;  %v346_v45 = vld [vmem:[%s1621_s6] sm:$0xff] }
  0x84   : > { %v403_v57 = vmax.f32 %v399_v58, %v3023_v49  ;;  %v404_v51 = vmax.f32 %v400_v59, %v3024_v61  ;;  %v405_v52 = vmax.f32 %v401_v47, %v3025_v0  ;;  %v406_v56 = vmax.f32 %v402_v48, %v3026_v63 }
  0x85   : > { %v341_v55 = vmin.f32 %v337_v46, %v338_v62  ;;  %v342_v50 = vmin.f32 %v339_v1, %v340_v60 }
  0x86   : > { %v407_v53 = vmax.f32 %v403_v57, %v404_v51  ;;  %v408_v6 = vmax.f32 %v405_v52, %v406_v56 }
  0x87   : > { %v343_v7 = vmin.f32 %v341_v55, %v342_v50 }
  0x88   : > { %v409_v3 = vmax.f32 %v407_v53, %v408_v6 }
  0x89   : > { %v344_v8 = vmin.f32 %v280_v54, %v343_v7 }
  0x8a   : > { %v410_v44 = vmax.f32 %v346_v45, %v409_v3 }
  0x8b   : > { %345 = vst [vmem:[%s1619_s20] sm:$0xff] %v344_v8 }
  0x8c   : > { %411 = vst [vmem:[%s1621_s6] sm:$0xff] %v410_v44 }
  0x8d PF: > { %p1161_p8 = scmp.le.s32.totalorder %s1669_s15, 4096 }
  0x8f   : > { %415 = sbr.rel (%p1161_p8) target bundleno = 313 (0x139), region = 40 }
  0x94   : > { %v416_v9 = vlaneseq  ;;  %v1972_v62 = vstv %s1159_s26 }
  0x96   : > { %v1961_v58 = vshrl.u32 %v416_v9, 7 }
  0x98   : > { %v418_v59 = vadd.s32 8, %v1961_v58  ;;  %v419_v47 = vadd.s32 16, %v1961_v58  ;;  %v420_v48 = vadd.s32 24, %v1961_v58  ;;  %v421_v49 = vadd.s32 32, %v1961_v58 }
  0x99   : > { %v422_v46 = vadd.s32 40, %v1961_v58  ;;  %v423_v44 = vadd.s32 48, %v1961_v58  ;;  %v424_v61 = vadd.s32 56, %v1961_v58  ;;  %v1976_v0 = vadd.s32 %v1972_v62, %v1961_v58 }
  0x9a   : > { %v1979_v1 = vadd.s32 %v1972_v62, %v418_v59  ;;  %v1982_v63 = vadd.s32 %v1972_v62, %v419_v47  ;;  %v1985_v60 = vadd.s32 %v1972_v62, %v420_v48  ;;  %v1988_v57 = vadd.s32 %v1972_v62, %v421_v49 }
  0x9b   : > { %v1991_v51 = vadd.s32 %v1972_v62, %v422_v46  ;;  %v1994_v52 = vadd.s32 %v1972_v62, %v423_v44  ;;  %v1997_v56 = vadd.s32 %v1972_v62, %v424_v61  ;;  %v458_v55 = vadd.s32 328, %v1961_v58 }
  0x9c   : > { %v459_v50 = vadd.s32 336, %v1961_v58  ;;  %v460_v54 = vadd.s32 344, %v1961_v58  ;;  %v461_v53 = vadd.s32 352, %v1961_v58  ;;  %v462_v6 = vadd.s32 360, %v1961_v58 }
  0x9d   : > { %v463_v7 = vadd.s32 368, %v1961_v58  ;;  %v464_v45 = vadd.s32 376, %v1961_v58  ;;  %v465_v3 = vadd.s32 384, %v1961_v58  ;;  %v466_v8 = vadd.s32 392, %v1961_v58 }
  0x9e   : > { %v467_v9 = vadd.s32 400, %v1961_v58  ;;  %v468_v59 = vadd.s32 408, %v1961_v58  ;;  %v469_v47 = vadd.s32 416, %v1961_v58  ;;  %v470_v48 = vadd.s32 424, %v1961_v58 }
  0x9f   : > { %v471_v49 = vadd.s32 432, %v1961_v58  ;;  %v472_v46 = vadd.s32 440, %v1961_v58  ;;  %v473_v44 = vadd.s32 448, %v1961_v58  ;;  %v474_v61 = vadd.s32 456, %v1961_v58 }
  0xa0   : > { %v475_v43 = vadd.s32 464, %v1961_v58  ;;  %v476_v42 = vadd.s32 472, %v1961_v58  ;;  %v477_v41 = vadd.s32 480, %v1961_v58  ;;  %v478_v40 = vadd.s32 488, %v1961_v58 }
  0xa1   : > { %v479_v39 = vadd.s32 496, %v1961_v58  ;;  %v480_v38 = vadd.s32 504, %v1961_v58  ;;  %v2023_v37 = vadd.s32 %v1972_v62, %v458_v55  ;;  %v2026_v36 = vadd.s32 %v1972_v62, %v459_v50 }
  0xa2   : > { %v2029_v35 = vadd.s32 %v1972_v62, %v460_v54  ;;  %v2032_v34 = vadd.s32 %v1972_v62, %v461_v53  ;;  %v2035_v33 = vadd.s32 %v1972_v62, %v462_v6  ;;  %v2038_v32 = vadd.s32 %v1972_v62, %v463_v7 }
  0xa3   : > { %3027 = vst [vmem:[#allocation59_spill] sm:$0xff] %v2023_v37  ;;  %3028 = vst [vmem:[#allocation60_spill] sm:$0xff] %v2026_v36  ;;  %v2041_v31 = vadd.s32 %v1972_v62, %v464_v45  ;;  %v2044_v55 = vadd.s32 %v1972_v62, %v465_v3  ;;  %v2047_v50 = vadd.s32 %v1972_v62, %v466_v8  ;;  %v447_v36 = vadd.s32 240, %v1961_v58 }
  0xa4   : > { %3029 = vst [vmem:[#allocation61_spill] sm:$0xff] %v2029_v35  ;;  %3030 = vst [vmem:[#allocation62_spill] sm:$0xff] %v2032_v34  ;;  %v2050_v54 = vadd.s32 %v1972_v62, %v467_v9  ;;  %v2053_v53 = vadd.s32 %v1972_v62, %v468_v59  ;;  %v2056_v6 = vadd.s32 %v1972_v62, %v469_v47  ;;  %v446_v34 = vadd.s32 232, %v1961_v58 }
  0xa5   : > { %3031 = vst [vmem:[#allocation63_spill] sm:$0xff] %v2035_v33  ;;  %3032 = vst [vmem:[#allocation64_spill] sm:$0xff] %v2038_v32  ;;  %v2059_v7 = vadd.s32 %v1972_v62, %v470_v48  ;;  %v2062_v45 = vadd.s32 %v1972_v62, %v471_v49  ;;  %v2065_v3 = vadd.s32 %v1972_v62, %v472_v46  ;;  %v443_v32 = vadd.s32 208, %v1961_v58 }
  0xa6   : > { %3033 = vst [vmem:[#allocation65_spill] sm:$0xff] %v2041_v31  ;;  %3034 = vst [vmem:[#allocation66_spill] sm:$0xff] %v2044_v55  ;;  %v2068_v8 = vadd.s32 %v1972_v62, %v473_v44  ;;  %v2071_v9 = vadd.s32 %v1972_v62, %v474_v61  ;;  %v2074_v59 = vadd.s32 %v1972_v62, %v475_v43  ;;  %v425_v61 = vadd.s32 64, %v1961_v58 }
  0xa7   : > { %3035 = vst [vmem:[#allocation67_spill] sm:$0xff] %v2047_v50  ;;  %3036 = vst [vmem:[#allocation68_spill] sm:$0xff] %v2050_v54  ;;  %v2077_v47 = vadd.s32 %v1972_v62, %v476_v42  ;;  %v2080_v48 = vadd.s32 %v1972_v62, %v477_v41  ;;  %v2083_v49 = vadd.s32 %v1972_v62, %v478_v40  ;;  %v426_v43 = vadd.s32 72, %v1961_v58 }
  0xa8   : > { %3037 = vst [vmem:[#allocation69_spill] sm:$0xff] %v2053_v53  ;;  %3038 = vst [vmem:[#allocation70_spill] sm:$0xff] %v2056_v6  ;;  %v2086_v46 = vadd.s32 %v1972_v62, %v479_v39  ;;  %v2089_v44 = vadd.s32 %v1972_v62, %v480_v38  ;;  %v428_v42 = vadd.s32 88, %v1961_v58  ;;  %v2096_v41 = vadd.s32 %v1972_v62, %v425_v61 }
  0xa9   : > { %3039 = vst [vmem:[#allocation71_spill] sm:$0xff] %v2059_v7  ;;  %3040 = vst [vmem:[#allocation72_spill] sm:$0xff] %v2062_v45  ;;  %v429_v40 = vadd.s32 96, %v1961_v58  ;;  %v430_v38 = vadd.s32 104, %v1961_v58  ;;  %v435_v45 = vadd.s32 144, %v1961_v58  ;;  %v437_v53 = vadd.s32 160, %v1961_v58 }
  0xaa   : > { %3041 = vst [vmem:[#allocation73_spill] sm:$0xff] %v2065_v3  ;;  %3042 = vst [vmem:[#allocation74_spill] sm:$0xff] %v2068_v8  ;;  %vm554_vm0 = vcmp.lt.s32.totalorder %v2096_v41, 4096  ;;  %v434_v8 = vadd.s32 136, %v1961_v58  ;;  %v439_v54 = vadd.s32 176, %v1961_v58  ;;  %v442_v55 = vadd.s32 200, %v1961_v58 }
  0xab   : > { %3043 = vst [vmem:[#allocation75_spill] sm:$0xff] %v2071_v9  ;;  %3044 = vst [vmem:[#allocation76_spill] sm:$0xff] %v2074_v59  ;;  %v427_v59 = vadd.s32 80, %v1961_v58  ;;  %v2112_v61 = vadd.s32 %v1972_v62, %v429_v40  ;;  %v2174_v37 = vadd.s32 %v1972_v62, %v435_v45  ;;  %v2180_v30 = vadd.s32 264, %v1961_v58 }
  0xac   : > { %3045 = vst [vmem:[#allocation77_spill] sm:$0xff] %v2077_v47  ;;  %3046 = vst [vmem:[#allocation78_spill] sm:$0xff] %v2080_v48  ;;  %v433_v47 = vadd.s32 128, %v1961_v58  ;;  %v2163_v33 = vadd.s32 %v1972_v62, %v434_v8  ;;  %v2186_v28 = vadd.s32 272, %v1961_v58  ;;  %v2196_v27 = vadd.s32 %v1972_v62, %v437_v53 }
  0xad   : > { %3047 = vst [vmem:[#allocation79_spill] sm:$0xff] %v2083_v49  ;;  %3048 = vst [vmem:[#allocation80_spill] sm:$0xff] %v2086_v46  ;;  %v2100_v49 = vadd.s32 %v1972_v62, %v426_v43  ;;  %v2103_v39 = vadd.s32 %v1972_v62, %v427_v59  ;;  %v431_v46 = vadd.s32 112, %v1961_v58  ;;  %v432_v43 = vadd.s32 120, %v1961_v58 }
  0xae   : > { %3049 = vst [vmem:[#allocation81_spill] sm:$0xff] %v2089_v44  ;;  %v2107_v44 = vadd.s32 %v1972_v62, %v428_v42  ;;  %v2118_v59 = vadd.s32 %v1972_v62, %v430_v38  ;;  %v746_v42 = vsel %vm554_vm0, %v1656_v10, inf  ;;  %vm558_vm4 = vcmp.lt.s32.totalorder %v2112_v61, 4096  ;;  %3051 = vst [vmem:[#allocation83_spill] sm:$0xff] %v2180_v30 }
  0xaf   : > { %vm555_vm1 = vcmp.lt.s32.totalorder %v2100_v49, 4096  ;;  %vm556_vm2 = vcmp.lt.s32.totalorder %v2103_v39, 4096  ;;  %v2132_v9 = vadd.s32 %v1972_v62, %v431_v46  ;;  %v2141_v7 = vadd.s32 %v1972_v62, %v432_v43  ;;  %3052 = vst [vmem:[#allocation84_spill] sm:$0xff] %v2186_v28 }
  0xb0   : > { %vm557_vm3 = vcmp.lt.s32.totalorder %v2107_v44, 4096  ;;  %v747_v40 = vsel %vm555_vm1, %v1659_v11, inf  ;;  %v748_v48 = vsel %vm556_vm2, %v1662_v12, inf  ;;  %vm559_vm5 = vcmp.lt.s32.totalorder %v2118_v59, 4096  ;;  %v3057_v59 = vld [vmem:[#allocation14_spill] sm:$0xff] }
  0xb1   : > { %v871_v38 = vmin.f32 %v747_v40, %v746_v42  ;;  %v749_v3 = vsel %vm557_vm3, %v1665_v13, inf  ;;  %3050 = vst [vmem:[#allocation82_spill] sm:$0xff] %v2141_v7  ;;  %v436_v46 = vadd.s32 152, %v1961_v58  ;;  %v438_v42 = vadd.s32 168, %v1961_v58 }
  0xb2   : > { %v750_v40 = vsel %vm558_vm4, %v1672_v14, inf  ;;  %v2152_v50 = vadd.s32 %v1972_v62, %v433_v47  ;;  %vm560_vm6 = vcmp.lt.s32.totalorder %v2132_v9, 4096  ;;  %v751_v31 = vsel %vm559_vm5, %v1675_v15, inf }
  0xb3   : > { %v872_v6 = vmin.f32 %v748_v48, %v871_v38  ;;  %v440_v48 = vadd.s32 184, %v1961_v58  ;;  %v441_v38 = vadd.s32 192, %v1961_v58  ;;  %vm561_vm7 = vcmp.lt.s32.totalorder %v2141_v7, 4096 }
  0xb4   : > { %v752_v35 = vsel %vm560_vm6, %v1678_v16, inf  ;;  %vm2954_vm8 = vcmp.lt.s32.totalorder %v2152_v50, 4096  ;;  %v753_v29 = vsel %vm561_vm7, %v1681_v17, inf  ;;  %v2189_v45 = vadd.s32 %v1972_v62, %v436_v46 }
  0xb5   : > { %v873_v43 = vmin.f32 %v749_v3, %v872_v6  ;;  %v444_v6 = vadd.s32 216, %v1961_v58  ;;  %v445_v3 = vadd.s32 224, %v1961_v58  ;;  %vm2952_vm9 = vcmp.lt.s32.totalorder %v2163_v33, 4096 }
  0xb6   : > { %v2199_v30 = vadd.s32 %v1972_v62, %v438_v42  ;;  %v754_v7 = vsel %vm2954_vm8, %v1684_v18, inf  ;;  %v2205_v28 = vadd.s32 %v1972_v62, %v439_v54  ;;  %v2208_v46 = vadd.s32 %v1972_v62, %v440_v48 }
  0xb7   : > { %v874_v47 = vmin.f32 %v750_v40, %v873_v43  ;;  %v448_v40 = vadd.s32 248, %v1961_v58  ;;  %v449_v43 = vadd.s32 256, %v1961_v58  ;;  %vm2951_vm10 = vcmp.lt.s32.totalorder %v2174_v37, 4096 }
  0xb8   : > { %3054 = vst [vmem:[#allocation86_spill] sm:$0xff] %v2208_v46  ;;  %v2215_v53 = vadd.s32 %v1972_v62, %v442_v55  ;;  %v2218_v42 = vadd.s32 %v1972_v62, %v443_v32  ;;  %v755_v54 = vsel %vm2952_vm9, %v1687_v19, inf  ;;  %v2227_v48 = vadd.s32 %v1972_v62, %v445_v3 }
  0xb9   : > { %v875_v8 = vmin.f32 %v751_v31, %v874_v47  ;;  %v2193_v47 = vadd.s32 280, %v1961_v58  ;;  %vm2950_vm11 = vcmp.lt.s32.totalorder %v2189_v45, 4096  ;;  %v2234_v55 = vadd.s32 %v1972_v62, %v447_v36 }
  0xba   : > { %3056 = vst [vmem:[#allocation88_spill] sm:$0xff] %v2215_v53  ;;  %v2237_v32 = vadd.s32 %v1972_v62, %v448_v40  ;;  %vm546_vm12 = vcmp.lt.s32.totalorder %v1976_v0, 4096  ;;  %vm2953_vm13 = vcmp.lt.s32.totalorder %v2196_v27, 4096  ;;  %v810_v36 = vsel %vm554_vm0, %v1656_v10, -inf }
  0xbb   : > { %v876_v31 = vmin.f32 %v752_v35, %v875_v8  ;;  %3053 = vst [vmem:[#allocation85_spill] sm:$0xff] %v2193_v47  ;;  %v2212_v8 = vadd.s32 %v1972_v62, %v441_v38  ;;  %v2224_v47 = vadd.s32 %v1972_v62, %v444_v6  ;;  %v2231_v38 = vadd.s32 %v1972_v62, %v446_v34 }
  0xbc   : > { %v756_v6 = vsel %vm2951_vm10, %v1690_v20, inf  ;;  %v757_v34 = vsel %vm2950_vm11, %v1693_v21, inf  ;;  %v811_v3 = vsel %vm555_vm1, %v1659_v11, -inf  ;;  %v812_v40 = vsel %vm556_vm2, %v1662_v12, -inf }
  0xbd   : > { %v877_v35 = vmin.f32 %v753_v29, %v876_v31  ;;  %3055 = vst [vmem:[#allocation87_spill] sm:$0xff] %v2212_v8  ;;  %v2243_v31 = vadd.s32 %v1972_v62, %v449_v43  ;;  %vm547_vm14 = vcmp.lt.s32.totalorder %v1979_v1, 4096  ;;  %vm2955_vm15 = vcmp.lt.s32.totalorder %v2199_v30, 4096 }
  0xbe   : > { %vm548_vm11 = vcmp.lt.s32.totalorder %v1982_v63, 4096  ;;  %vm549_vm10 = vcmp.lt.s32.totalorder %v1985_v60, 4096  ;;  %v758_v10 = vsel %vm2953_vm13, %v1696_v22, inf  ;;  %v813_v11 = vsel %vm557_vm3, %v1665_v13, -inf }
  0xbf   : > { %v878_v29 = vmin.f32 %v754_v7, %v877_v35  ;;  %v937_v35 = vmax.f32 %v811_v3, %v810_v36  ;;  %vm550_vm0 = vcmp.lt.s32.totalorder %v1988_v57, 4096  ;;  %vm568_vm1 = vcmp.lt.s32.totalorder %v2205_v28, 4096 }
  0xc0   : > { %v759_v41 = vsel %vm2955_vm15, %v1699_v23, inf  ;;  %v814_v39 = vsel %vm558_vm4, %v1672_v14, -inf  ;;  %vm569_vm13 = vcmp.lt.s32.totalorder %v2208_v46, 4096  ;;  %vm2956_vm8 = vcmp.lt.s32.totalorder %v2212_v8, 4096 }
  0xc1   : > { %v879_v7 = vmin.f32 %v755_v54, %v878_v29  ;;  %v938_v49 = vmax.f32 %v812_v40, %v937_v35  ;;  %vm571_vm2 = vcmp.lt.s32.totalorder %v2215_v53, 4096  ;;  %v760_v54 = vsel %vm568_vm1, %v1702_v24, inf  ;;  %v3071_v53 = vld [vmem:[#allocation24_spill] sm:$0xff] }
  0xc2   : > { %v815_v29 = vsel %vm559_vm5, %v1675_v15, -inf  ;;  %vm572_vm4 = vcmp.lt.s32.totalorder %v2218_v42, 4096  ;;  %vm573_vm15 = vcmp.lt.s32.totalorder %v2224_v47, 4096  ;;  %vm574_vm3 = vcmp.lt.s32.totalorder %v2227_v48, 4096 }
  0xc3   : > { %v880_v43 = vmin.f32 %v756_v6, %v879_v7  ;;  %v939_v44 = vmax.f32 %v813_v11, %v938_v49  ;;  %vm575_vm9 = vcmp.lt.s32.totalorder %v2231_v38, 4096  ;;  %v761_v6 = vsel %vm569_vm13, %v1705_v25, inf }
  0xc4   : > { %v816_v7 = vsel %vm560_vm6, %v1678_v16, -inf  ;;  %v2302_v15 = vsel %vm546_vm12, %v1628_v2, inf  ;;  %v2312_v40 = vsel %vm548_vm11, %v1634_v4, inf  ;;  %v2317_v16 = vsel %vm549_vm10, %v1640_v5, inf }
  0xc5   : > { %v881_v12 = vmin.f32 %v757_v34, %v880_v43  ;;  %v940_v61 = vmax.f32 %v814_v39, %v939_v44  ;;  %v2307_v34 = vsel %vm547_vm14, %v3057_v59, inf  ;;  %v762_v9 = vsel %vm2956_vm8, %v1708_v26, inf  ;;  %v3070_v26 = vld [vmem:[#allocation23_spill] sm:$0xff] }
  0xc6   : > { %v817_v35 = vsel %vm561_vm7, %v1681_v17, -inf  ;;  %vm576_vm5 = vcmp.lt.s32.totalorder %v2234_v55, 4096  ;;  %vm3061_vm6 = vcmp.lt.s32.totalorder %v1991_v51, 4096  ;;  %vm3063_vm8 = vcmp.lt.s32.totalorder %v1994_v52, 4096  ;;  %v3064_v17 = vld [vmem:[#allocation18_spill] sm:$0xff] }
  0xc7   : > { %v882_v13 = vmin.f32 %v758_v10, %v881_v12  ;;  %v941_v3 = vmax.f32 %v815_v29, %v940_v61  ;;  %v3059_v10 = vld [vmem:[#allocation15_spill] sm:$0xff]  ;;  %v3060_v12 = vld [vmem:[#allocation16_spill] sm:$0xff]  ;;  %vm3065_vm7 = vcmp.lt.s32.totalorder %v1997_v56, 4096  ;;  %v766_v46 = vsel %vm574_vm3, %v3070_v26, inf }
  0xc8   : > { %v2329_v11 = vsel %vm550_vm0, %v3059_v10, inf  ;;  %v2334_v49 = vsel %vm3061_vm6, %v3060_v12, inf  ;;  %v3066_v29 = vld [vmem:[#allocation20_spill] sm:$0xff]  ;;  %vm3067_vm6 = vcmp.lt.s32.totalorder %v2152_v50, 4096 }
  0xc9   : > { %v883_v14 = vmin.f32 %v759_v41, %v882_v13  ;;  %v942_v39 = vmax.f32 %v816_v7, %v941_v3  ;;  %v3062_v13 = vld [vmem:[#allocation17_spill] sm:$0xff]  ;;  %v818_v61 = vsel %vm3067_vm6, %v1684_v18, -inf  ;;  %v3069_v3 = vld [vmem:[#allocation22_spill] sm:$0xff]  ;;  %v2367_v18 = vsel %vm546_vm12, %v1628_v2, -inf }
  0xca   : > { %v2339_v44 = vsel %vm3063_vm8, %v3062_v13, inf  ;;  %v3068_v7 = vld [vmem:[#allocation21_spill] sm:$0xff]  ;;  %v765_v43 = vsel %vm573_vm15, %v3069_v3, inf  ;;  %vm3072_vm8 = vcmp.lt.s32.totalorder %v2163_v33, 4096  ;;  %v2385_v2 = vsel %vm549_vm10, %v1640_v5, -inf  ;;  %vm3076_vm10 = vmmov %vm3065_vm7 }
  0xcb   : > { %v884_v36 = vmin.f32 %v760_v54, %v883_v14  ;;  %v2344_v54 = vsel %vm3065_vm7, %v3064_v17, inf  ;;  %v763_v14 = vsel %vm571_vm2, %v3066_v29, inf  ;;  %v943_v8 = vmax.f32 %v817_v35, %v942_v39 }
  0xcc   : > { %v767_v29 = vsel %vm575_vm9, %v3071_v53, inf  ;;  %v819_v50 = vsel %vm3072_vm8, %v1687_v19, -inf  ;;  %v2375_v35 = vsel %vm547_vm14, %v3057_v59, -inf  ;;  %v2390_v19 = vsel %vm550_vm0, %v3059_v10, -inf  ;;  %v3079_v59 = vld [vmem:[#allocation83_spill] sm:$0xff] }
  0xcd   : > { %v885_v41 = vmin.f32 %v761_v6, %v884_v36  ;;  %v764_v36 = vsel %vm572_vm4, %v3068_v7, inf  ;;  %v944_v39 = vmax.f32 %v818_v61, %v943_v8  ;;  %vm3073_vm12 = vcmp.lt.s32.totalorder %v1991_v51, 4096 }
  0xce   : > { %v2395_v33 = vsel %vm3073_vm12, %v3060_v12, -inf  ;;  %vm3075_vm14 = vcmp.lt.s32.totalorder %v1994_v52, 4096  ;;  %v2408_v1 = vsel %vm3076_vm10, %v3064_v17, -inf  ;;  %vm3077_vm0 = vcmp.lt.s32.totalorder %v2189_v45, 4096 }
  0xcf   : > { %v886_v6 = vmin.f32 %v762_v9, %v885_v41  ;;  %v2380_v41 = vsel %vm548_vm11, %v1634_v4, -inf  ;;  %vm3074_vm11 = vcmp.lt.s32.totalorder %v2174_v37, 4096  ;;  %v2403_v5 = vsel %vm3075_vm14, %v3062_v13, -inf }
  0xd0   : > { %v820_v4 = vsel %vm3074_vm11, %v1690_v20, -inf  ;;  %v945_v63 = vmax.f32 %v819_v50, %v944_v39  ;;  %v821_v60 = vsel %vm3077_vm0, %v1693_v21, -inf  ;;  %vm3078_vm7 = vcmp.lt.s32.totalorder %v2196_v27, 4096  ;;  %v3083_v39 = vld [vmem:[#allocation26_spill] sm:$0xff] }
  0xd1   : > { %v887_v9 = vmin.f32 %v763_v14, %v886_v6  ;;  %v822_v20 = vsel %vm3078_vm7, %v1696_v22, -inf  ;;  %v867_v37 = vmin.f32 %v2302_v15, %v2329_v11  ;;  %v868_v57 = vmin.f32 %v2307_v34, %v2334_v49  ;;  %v3080_v14 = vld [vmem:[#allocation25_spill] sm:$0xff]  ;;  %v3094_v27 = vld [vmem:[#allocation30_spill] sm:$0xff] }
  0xd2   : > { %v946_v52 = vmax.f32 %v820_v4, %v945_v63  ;;  %v869_v56 = vmin.f32 %v2312_v40, %v2339_v44  ;;  %v870_v8 = vmin.f32 %v2317_v16, %v2344_v54  ;;  %v933_v21 = vmax.f32 %v2367_v18, %v2390_v19 }
  0xd3   : > { %v888_v0 = vmin.f32 %v764_v36, %v887_v9  ;;  %v934_v22 = vmax.f32 %v2375_v35, %v2395_v33  ;;  %v2434_v10 = vadd.s32 %v1972_v62, %v3079_v59  ;;  %vm577_vm6 = vcmp.lt.s32.totalorder %v2237_v32, 4096  ;;  %v3082_v36 = vld [vmem:[#allocation84_spill] sm:$0xff] }
  0xd4   : > { %v947_v13 = vmax.f32 %v821_v60, %v946_v52  ;;  %v453_v17 = vadd.s32 288, %v1961_v58  ;;  %v768_v61 = vsel %vm576_vm5, %v3080_v14, inf  ;;  %vm3081_vm8 = vcmp.lt.s32.totalorder %v2199_v30, 4096  ;;  %v3084_v30 = vld [vmem:[#allocation85_spill] sm:$0xff] }
  0xd5   : > { %v889_v51 = vmin.f32 %v765_v43, %v888_v0  ;;  %v823_v6 = vsel %vm3081_vm8, %v1699_v23, -inf  ;;  %v2446_v43 = vadd.s32 %v1972_v62, %v3082_v36  ;;  %vm578_vm12 = vcmp.lt.s32.totalorder %v2243_v31, 4096  ;;  %v3088_v36 = vld [vmem:[#allocation19_spill] sm:$0xff] }
  0xd6   : > { %v948_v9 = vmax.f32 %v822_v20, %v947_v13  ;;  %v769_v4 = vsel %vm577_vm6, %v3083_v39, inf  ;;  %v824_v0 = vsel %vm568_vm1, %v1702_v24, -inf  ;;  %v2458_v23 = vadd.s32 %v1972_v62, %v3084_v30  ;;  %v3085_v20 = vld [vmem:[#allocation27_spill] sm:$0xff] }
  0xd7   : > { %v890_v12 = vmin.f32 %v766_v46, %v889_v51  ;;  %v454_v46 = vadd.s32 296, %v1961_v58  ;;  %vm579_vm11 = vcmp.lt.s32.totalorder %v2434_v10, 4096  ;;  %v770_v51 = vsel %vm578_vm12, %v3085_v20, inf }
  0xd8   : > { %v949_v60 = vmax.f32 %v823_v6, %v948_v9  ;;  %v825_v59 = vsel %vm569_vm13, %v1705_v25, -inf  ;;  %v2469_v24 = vadd.s32 %v1972_v62, %v453_v17  ;;  %vm580_vm1 = vcmp.lt.s32.totalorder %v2446_v43, 4096 }
  0xd9   : > { %v891_v50 = vmin.f32 %v767_v29, %v890_v12  ;;  %v455_v29 = vadd.s32 304, %v1961_v58  ;;  %v456_v13 = vadd.s32 312, %v1961_v58  ;;  %v2480_v30 = vadd.s32 %v1972_v62, %v454_v46 }
  0xda   : > { %v950_v12 = vmax.f32 %v824_v0, %v949_v60  ;;  %vm581_vm13 = vcmp.lt.s32.totalorder %v2458_v23, 4096  ;;  %v3091_v0 = vld [vmem:[#allocation29_spill] sm:$0xff]  ;;  %v3092_v60 = vld [vmem:[#allocation20_spill] sm:$0xff]  ;;  %vm582_vm10 = vcmp.lt.s32.totalorder %v2469_v24, 4096  ;;  %v832_v48 = vsel %vm576_vm5, %v3080_v14, -inf }
  0xdb   : > { %v892_v63 = vmin.f32 %v768_v61, %v891_v50  ;;  %v3087_v61 = vld [vmem:[#allocation28_spill] sm:$0xff]  ;;  %v3089_v50 = vld [vmem:[#allocation87_spill] sm:$0xff]  ;;  %v827_v45 = vsel %vm571_vm2, %v3092_v60, -inf  ;;  %vm583_vm2 = vcmp.lt.s32.totalorder %v2480_v30, 4096  ;;  %v833_v38 = vsel %vm577_vm6, %v3083_v39, -inf }
  0xdc   : > { %v771_v6 = vsel %vm579_vm11, %v3087_v61, inf  ;;  %vm3090_vm14 = vcmp.lt.s32.totalorder %v3089_v50, 4096  ;;  %v951_v17 = vmax.f32 %v825_v59, %v950_v12  ;;  %v2491_v50 = vadd.s32 %v1972_v62, %v455_v29  ;;  %v3095_v12 = vld [vmem:[#allocation31_spill] sm:$0xff] }
  0xdd   : > { %v893_v28 = vmin.f32 %v769_v4, %v892_v63  ;;  %v826_v9 = vsel %vm3090_vm14, %v3088_v36, -inf  ;;  %v457_v4 = vadd.s32 320, %v1961_v58  ;;  %v772_v63 = vsel %vm580_vm1, %v3091_v0, inf }
  0xde   : > { %v952_v36 = vmax.f32 %v826_v9, %v951_v17  ;;  %v828_v58 = vsel %vm572_vm4, %v3068_v7, -inf  ;;  %v2501_v59 = vadd.s32 %v1972_v62, %v456_v13  ;;  %v829_v9 = vsel %vm573_vm15, %v3069_v3, -inf  ;;  %v3096_v13 = vld [vmem:[#allocation32_spill] sm:$0xff]  ;;  %v3097_v3 = vld [vmem:[#allocation33_spill] sm:$0xff] }
  0xdf   : > { %v894_v25 = vmin.f32 %v770_v51, %v893_v28  ;;  %v773_v51 = vsel %vm581_vm13, %v3094_v27, inf  ;;  %vm584_vm4 = vcmp.lt.s32.totalorder %v2491_v50, 4096  ;;  %v775_v17 = vsel %vm583_vm2, %v3096_v13, inf }
  0xe0   : > { %v953_v29 = vmax.f32 %v827_v45, %v952_v36  ;;  %v830_v45 = vsel %vm574_vm3, %v3070_v26, -inf  ;;  %vm585_vm0 = vcmp.lt.s32.totalorder %v2501_v59, 4096  ;;  %v3099_v36 = vld [vmem:[#allocation59_spill] sm:$0xff]  ;;  %v834_v14 = vsel %vm578_vm12, %v3085_v20, -inf }
  0xe1   : > { %v895_v46 = vmin.f32 %v771_v6, %v894_v25  ;;  %v774_v6 = vsel %vm582_vm10, %v3095_v12, inf  ;;  %v2511_v25 = vadd.s32 %v1972_v62, %v457_v4  ;;  %v776_v62 = vsel %vm584_vm4, %v3097_v3, inf }
  0xe2   : > { %v954_v7 = vmax.f32 %v828_v58, %v953_v29  ;;  %v831_v4 = vsel %vm575_vm9, %v3071_v53, -inf  ;;  %vm587_vm3 = vcmp.lt.s32.totalorder %v3099_v36, 4096  ;;  %v3101_v29 = vld [vmem:[#allocation60_spill] sm:$0xff]  ;;  %v835_v39 = vsel %vm579_vm11, %v3087_v61, -inf }
  0xe3   : > { %v896_v28 = vmin.f32 %v772_v63, %v895_v46  ;;  %vm586_vm15 = vcmp.lt.s32.totalorder %v2511_v25, 4096  ;;  %v3098_v46 = vld [vmem:[#allocation34_spill] sm:$0xff]  ;;  %vm588_vm9 = vcmp.lt.s32.totalorder %v3101_v29, 4096  ;;  %v836_v20 = vsel %vm580_vm1, %v3091_v0, -inf }
  0xe4   : > { %v955_v47 = vmax.f32 %v829_v9, %v954_v7  ;;  %v777_v26 = vsel %vm585_vm0, %v3098_v46, inf  ;;  %v3103_v7 = vld [vmem:[#allocation61_spill] sm:$0xff]  ;;  %v837_v61 = vsel %vm581_vm13, %v3094_v27, -inf  ;;  %v838_v0 = vsel %vm582_vm10, %v3095_v12, -inf }
  0xe5   : > { %v897_v42 = vmin.f32 %v773_v51, %v896_v28  ;;  %v3100_v28 = vld [vmem:[#allocation35_spill] sm:$0xff]  ;;  %vm589_vm5 = vcmp.lt.s32.totalorder %v3103_v7, 4096  ;;  %v839_v23 = vsel %vm583_vm2, %v3096_v13, -inf  ;;  %v840_v12 = vsel %vm584_vm4, %v3097_v3, -inf }
  0xe6   : > { %v956_v52 = vmax.f32 %v830_v45, %v955_v47  ;;  %v778_v53 = vsel %vm586_vm15, %v3100_v28, inf  ;;  %v3105_v47 = vld [vmem:[#allocation62_spill] sm:$0xff]  ;;  %v841_v13 = vsel %vm585_vm0, %v3098_v46, -inf  ;;  %v842_v3 = vsel %vm586_vm15, %v3100_v28, -inf }
  0xe7   : > { %v898_v63 = vmin.f32 %v774_v6, %v897_v42  ;;  %v3102_v42 = vld [vmem:[#allocation36_spill] sm:$0xff]  ;;  %vm590_vm7 = vcmp.lt.s32.totalorder %v3105_v47, 4096 }
  0xe8   : > { %v957_v58 = vmax.f32 %v831_v4, %v956_v52  ;;  %v779_v55 = vsel %vm587_vm3, %v3102_v42, inf  ;;  %v3107_v52 = vld [vmem:[#allocation63_spill] sm:$0xff]  ;;  %v843_v46 = vsel %vm587_vm3, %v3102_v42, -inf }
  0xe9   : > { %v899_v60 = vmin.f32 %v775_v17, %v898_v63  ;;  %v3104_v63 = vld [vmem:[#allocation37_spill] sm:$0xff]  ;;  %vm591_vm6 = vcmp.lt.s32.totalorder %v3107_v52, 4096 }
  0xea   : > { %v958_v9 = vmax.f32 %v832_v48, %v957_v58  ;;  %v780_v32 = vsel %vm588_vm9, %v3104_v63, inf  ;;  %v3109_v58 = vld [vmem:[#allocation64_spill] sm:$0xff]  ;;  %v844_v28 = vsel %vm588_vm9, %v3104_v63, -inf }
  0xeb   : > { %v900_v51 = vmin.f32 %v776_v62, %v899_v60  ;;  %v3106_v60 = vld [vmem:[#allocation38_spill] sm:$0xff]  ;;  %vm592_vm8 = vcmp.lt.s32.totalorder %v3109_v58, 4096 }
  0xec   : > { %v959_v45 = vmax.f32 %v833_v38, %v958_v9  ;;  %v781_v31 = vsel %vm589_vm5, %v3106_v60, inf  ;;  %v3111_v9 = vld [vmem:[#allocation65_spill] sm:$0xff]  ;;  %v845_v42 = vsel %vm589_vm5, %v3106_v60, -inf }
  0xed   : > { %v901_v6 = vmin.f32 %v777_v26, %v900_v51  ;;  %v3108_v51 = vld [vmem:[#allocation39_spill] sm:$0xff]  ;;  %vm593_vm12 = vcmp.lt.s32.totalorder %v3111_v9, 4096 }
  0xee   : > { %v960_v4 = vmax.f32 %v834_v14, %v959_v45  ;;  %v782_v10 = vsel %vm590_vm7, %v3108_v51, inf  ;;  %v3113_v45 = vld [vmem:[#allocation66_spill] sm:$0xff]  ;;  %v846_v63 = vsel %vm590_vm7, %v3108_v51, -inf }
  0xef   : > { %v902_v17 = vmin.f32 %v778_v53, %v901_v6  ;;  %v3110_v6 = vld [vmem:[#allocation40_spill] sm:$0xff]  ;;  %vm594_vm11 = vcmp.lt.s32.totalorder %v3113_v45, 4096 }
  0xf0   : > { %v961_v48 = vmax.f32 %v835_v39, %v960_v4  ;;  %v783_v43 = vsel %vm591_vm6, %v3110_v6, inf  ;;  %v3115_v4 = vld [vmem:[#allocation67_spill] sm:$0xff]  ;;  %v847_v60 = vsel %vm591_vm6, %v3110_v6, -inf }
  0xf1   : > { %v903_v62 = vmin.f32 %v779_v55, %v902_v17  ;;  %v3112_v17 = vld [vmem:[#allocation41_spill] sm:$0xff]  ;;  %vm595_vm1 = vcmp.lt.s32.totalorder %v3115_v4, 4096 }
  0xf2   : > { %v962_v38 = vmax.f32 %v836_v20, %v961_v48  ;;  %v784_v27 = vsel %vm592_vm8, %v3112_v17, inf  ;;  %v3117_v48 = vld [vmem:[#allocation68_spill] sm:$0xff]  ;;  %v848_v51 = vsel %vm592_vm8, %v3112_v17, -inf }
  0xf3   : > { %v904_v26 = vmin.f32 %v780_v32, %v903_v62  ;;  %v3114_v62 = vld [vmem:[#allocation42_spill] sm:$0xff]  ;;  %vm596_vm14 = vcmp.lt.s32.totalorder %v3117_v48, 4096 }
  0xf4   : > { %v963_v14 = vmax.f32 %v837_v61, %v962_v38  ;;  %v785_v24 = vsel %vm593_vm12, %v3114_v62, inf  ;;  %v3119_v38 = vld [vmem:[#allocation69_spill] sm:$0xff]  ;;  %v849_v6 = vsel %vm593_vm12, %v3114_v62, -inf }
  0xf5   : > { %v905_v53 = vmin.f32 %v781_v31, %v904_v26  ;;  %v3116_v26 = vld [vmem:[#allocation43_spill] sm:$0xff]  ;;  %vm597_vm13 = vcmp.lt.s32.totalorder %v3119_v38, 4096 }
  0xf6   : > { %v964_v39 = vmax.f32 %v838_v0, %v963_v14  ;;  %v786_v30 = vsel %vm594_vm11, %v3116_v26, inf  ;;  %v3121_v14 = vld [vmem:[#allocation70_spill] sm:$0xff]  ;;  %v850_v17 = vsel %vm594_vm11, %v3116_v26, -inf }
  0xf7   : > { %v906_v55 = vmin.f32 %v782_v10, %v905_v53  ;;  %v3118_v53 = vld [vmem:[#allocation44_spill] sm:$0xff]  ;;  %vm598_vm10 = vcmp.lt.s32.totalorder %v3121_v14, 4096 }
  0xf8   : > { %v965_v20 = vmax.f32 %v839_v23, %v964_v39  ;;  %v787_v50 = vsel %vm595_vm1, %v3118_v53, inf  ;;  %v3123_v39 = vld [vmem:[#allocation71_spill] sm:$0xff]  ;;  %v851_v62 = vsel %vm595_vm1, %v3118_v53, -inf }
  0xf9   : > { %v907_v32 = vmin.f32 %v783_v43, %v906_v55  ;;  %v3120_v55 = vld [vmem:[#allocation45_spill] sm:$0xff]  ;;  %vm599_vm2 = vcmp.lt.s32.totalorder %v3123_v39, 4096 }
  0xfa   : > { %v966_v61 = vmax.f32 %v840_v12, %v965_v20  ;;  %v788_v59 = vsel %vm596_vm14, %v3120_v55, inf  ;;  %v3125_v20 = vld [vmem:[#allocation72_spill] sm:$0xff]  ;;  %v852_v26 = vsel %vm596_vm14, %v3120_v55, -inf }
  0xfb   : > { %v908_v31 = vmin.f32 %v784_v27, %v907_v32  ;;  %v3122_v32 = vld [vmem:[#allocation46_spill] sm:$0xff]  ;;  %vm600_vm4 = vcmp.lt.s32.totalorder %v3125_v20, 4096 }
  0xfc   : > { %v967_v0 = vmax.f32 %v841_v13, %v966_v61  ;;  %v789_v25 = vsel %vm597_vm13, %v3122_v32, inf  ;;  %v3127_v61 = vld [vmem:[#allocation73_spill] sm:$0xff]  ;;  %v853_v53 = vsel %vm597_vm13, %v3122_v32, -inf }
  0xfd   : > { %v909_v10 = vmin.f32 %v785_v24, %v908_v31  ;;  %v3124_v31 = vld [vmem:[#allocation47_spill] sm:$0xff]  ;;  %vm601_vm0 = vcmp.lt.s32.totalorder %v3127_v61, 4096 }
  0xfe   : > { %v968_v23 = vmax.f32 %v842_v3, %v967_v0  ;;  %v790_v36 = vsel %vm598_vm10, %v3124_v31, inf  ;;  %v3129_v0 = vld [vmem:[#allocation74_spill] sm:$0xff]  ;;  %v854_v55 = vsel %vm598_vm10, %v3124_v31, -inf }
  0xff   : > { %v910_v43 = vmin.f32 %v786_v30, %v909_v10  ;;  %v3126_v10 = vld [vmem:[#allocation48_spill] sm:$0xff]  ;;  %vm602_vm15 = vcmp.lt.s32.totalorder %v3129_v0, 4096 }
 0x100   : > { %v969_v12 = vmax.f32 %v843_v46, %v968_v23  ;;  %v791_v29 = vsel %vm599_vm2, %v3126_v10, inf  ;;  %v3131_v23 = vld [vmem:[#allocation75_spill] sm:$0xff]  ;;  %v855_v32 = vsel %vm599_vm2, %v3126_v10, -inf }
 0x101   : > { %v911_v27 = vmin.f32 %v787_v50, %v910_v43  ;;  %v3128_v43 = vld [vmem:[#allocation49_spill] sm:$0xff]  ;;  %vm603_vm3 = vcmp.lt.s32.totalorder %v3131_v23, 4096 }
 0x102   : > { %v970_v13 = vmax.f32 %v844_v28, %v969_v12  ;;  %v792_v7 = vsel %vm600_vm4, %v3128_v43, inf  ;;  %v3133_v12 = vld [vmem:[#allocation76_spill] sm:$0xff]  ;;  %v856_v14 = vsel %vm600_vm4, %v3128_v43, -inf }
 0x103   : > { %v912_v24 = vmin.f32 %v788_v59, %v911_v27  ;;  %v3130_v27 = vld [vmem:[#allocation50_spill] sm:$0xff]  ;;  %vm604_vm9 = vcmp.lt.s32.totalorder %v3133_v12, 4096 }
 0x104   : > { %v971_v3 = vmax.f32 %v845_v42, %v970_v13  ;;  %v793_v47 = vsel %vm601_vm0, %v3130_v27, inf  ;;  %v3135_v13 = vld [vmem:[#allocation77_spill] sm:$0xff] }
 0x105   : > { %v913_v30 = vmin.f32 %v789_v25, %v912_v24  ;;  %v3132_v24 = vld [vmem:[#allocation51_spill] sm:$0xff]  ;;  %vm605_vm5 = vcmp.lt.s32.totalorder %v3135_v13, 4096 }
 0x106   : > { %v972_v46 = vmax.f32 %v846_v63, %v971_v3  ;;  %v794_v52 = vsel %vm602_vm15, %v3132_v24, inf  ;;  %v3137_v3 = vld [vmem:[#allocation78_spill] sm:$0xff]  ;;  %v858_v10 = vsel %vm602_vm15, %v3132_v24, -inf }
 0x107   : > { %v914_v50 = vmin.f32 %v790_v36, %v913_v30  ;;  %v3134_v30 = vld [vmem:[#allocation52_spill] sm:$0xff]  ;;  %vm606_vm7 = vcmp.lt.s32.totalorder %v3137_v3, 4096 }
 0x108   : > { %v973_v28 = vmax.f32 %v847_v60, %v972_v46  ;;  %v795_v58 = vsel %vm603_vm3, %v3134_v30, inf  ;;  %v3139_v46 = vld [vmem:[#allocation79_spill] sm:$0xff]  ;;  %v859_v20 = vsel %vm603_vm3, %v3134_v30, -inf  ;;  %v932_v30 = vld [vmem:[%s1621_s6] sm:$0xff] }
 0x109   : > { %v915_v59 = vmin.f32 %v791_v29, %v914_v50  ;;  %v3136_v50 = vld [vmem:[#allocation53_spill] sm:$0xff]  ;;  %vm607_vm6 = vcmp.lt.s32.totalorder %v3139_v46, 4096 }
 0x10a   : > { %v974_v42 = vmax.f32 %v848_v51, %v973_v28  ;;  %v796_v9 = vsel %vm604_vm9, %v3136_v50, inf  ;;  %v3141_v28 = vld [vmem:[#allocation80_spill] sm:$0xff] }
 0x10b   : > { %v916_v25 = vmin.f32 %v792_v7, %v915_v59  ;;  %v3138_v59 = vld [vmem:[#allocation54_spill] sm:$0xff]  ;;  %vm608_vm8 = vcmp.lt.s32.totalorder %v3141_v28, 4096 }
 0x10c   : > { %v975_v63 = vmax.f32 %v849_v6, %v974_v42  ;;  %v797_v45 = vsel %vm605_vm5, %v3138_v59, inf  ;;  %v3143_v42 = vld [vmem:[#allocation81_spill] sm:$0xff]  ;;  %v861_v23 = vsel %vm605_vm5, %v3138_v59, -inf  ;;  %v3147_v59 = vmax.f32 %v2385_v2, %v2408_v1 }
 0x10d   : > { %v917_v36 = vmin.f32 %v793_v47, %v916_v25  ;;  %v3140_v25 = vld [vmem:[#allocation55_spill] sm:$0xff]  ;;  %vm609_vm12 = vcmp.lt.s32.totalorder %v3143_v42, 4096 }
 0x10e   : > { %v976_v60 = vmax.f32 %v850_v17, %v975_v63  ;;  %v798_v4 = vsel %vm606_vm7, %v3140_v25, inf  ;;  %v862_v11 = vsel %vm606_vm7, %v3140_v25, -inf }
 0x10f   : > { %v918_v29 = vmin.f32 %v794_v52, %v917_v36  ;;  %v3142_v36 = vld [vmem:[#allocation56_spill] sm:$0xff] }
 0x110   : > { %v977_v51 = vmax.f32 %v851_v62, %v976_v60  ;;  %v799_v48 = vsel %vm607_vm6, %v3142_v36, inf  ;;  %v3145_v62 = vld [vmem:[#allocation58_spill] sm:$0xff]  ;;  %v863_v49 = vsel %vm607_vm6, %v3142_v36, -inf }
 0x111   : > { %v919_v7 = vmin.f32 %v795_v58, %v918_v29  ;;  %v3144_v29 = vld [vmem:[#allocation57_spill] sm:$0xff] }
 0x112   : > { %v978_v6 = vmax.f32 %v852_v26, %v977_v51  ;;  %v800_v38 = vsel %vm608_vm8, %v3144_v29, inf  ;;  %v866_v26 = vld [vmem:[%s1619_s20] sm:$0xff]  ;;  %v864_v40 = vsel %vm608_vm8, %v3144_v29, -inf }
 0x113   : > { %v920_v47 = vmin.f32 %v796_v9, %v919_v7  ;;  %v801_v7 = vsel %vm609_vm12, %v3145_v62, inf }
 0x114   : > { %v979_v17 = vmax.f32 %v853_v53, %v978_v6 }
 0x115   : > { %v921_v52 = vmin.f32 %v797_v45, %v920_v47  ;;  %v857_v45 = vsel %vm601_vm0, %v3130_v27, -inf  ;;  %v860_v27 = vsel %vm604_vm9, %v3136_v50, -inf  ;;  %v3146_v50 = vmax.f32 %v2380_v41, %v2403_v5 }
 0x116   : > { %v980_v9 = vmax.f32 %v854_v55, %v979_v17 }
 0x117   : > { %v922_v58 = vmin.f32 %v798_v4, %v921_v52 }
 0x118   : > { %v981_v60 = vmax.f32 %v855_v32, %v980_v9 }
 0x119   : > { %v923_v63 = vmin.f32 %v799_v48, %v922_v58 }
 0x11a   : > { %v982_v39 = vmax.f32 %v856_v14, %v981_v60 }
 0x11b   : > { %v924_v31 = vmin.f32 %v800_v38, %v923_v63 }
 0x11c   : > { %v983_v51 = vmax.f32 %v857_v45, %v982_v39 }
 0x11d   : > { %v925_v47 = vmin.f32 %v801_v7, %v924_v31 }
 0x11e   : > { %v984_v43 = vmax.f32 %v858_v10, %v983_v51 }
 0x11f   : > { %v926_v4 = vmin.f32 %v866_v26, %v925_v47 }
 0x120   : > { %v985_v53 = vmax.f32 %v859_v20, %v984_v43 }
 0x121   : > { %v927_v61 = vmin.f32 %v867_v37, %v926_v4 }
 0x122   : > { %v986_v24 = vmax.f32 %v860_v27, %v985_v53 }
 0x123   : > { %v928_v0 = vmin.f32 %v868_v57, %v927_v61 }
 0x124   : > { %v987_v37 = vmax.f32 %v861_v23, %v986_v24 }
 0x125   : > { %v929_v15 = vmin.f32 %v869_v56, %v928_v0  ;;  %v865_v56 = vsel %vm609_vm12, %v3145_v62, -inf }
 0x126   : > { %v988_v57 = vmax.f32 %v862_v11, %v987_v37 }
 0x127   : > { %v930_v34 = vmin.f32 %v870_v8, %v929_v15 }
 0x128   : > { %v989_v44 = vmax.f32 %v863_v49, %v988_v57 }
 0x129   : > { %931 = vst [vmem:[%s1619_s20] sm:$0xff] %v930_v34 }
 0x12a   : > { %v990_v12 = vmax.f32 %v864_v40, %v989_v44 }
 0x12c   : > { %v991_v16 = vmax.f32 %v865_v56, %v990_v12 }
 0x12e   : > { %v992_v54 = vmax.f32 %v932_v30, %v991_v16 }
 0x130   : > { %v993_v8 = vmax.f32 %v933_v21, %v992_v54 }
 0x132   : > { %v994_v13 = vmax.f32 %v934_v22, %v993_v8 }
 0x134   : > { %v995_v3 = vmax.f32 %v3146_v50, %v994_v13 }
 0x136   : > { %v996_v46 = vmax.f32 %v3147_v59, %v995_v3 }
 0x138   : > { %997 = vst [vmem:[%s1621_s6] sm:$0xff] %v996_v46 }
 0x139 PF: > { %s1164_s25 = sshll.u32 %s1446_s16, 7  ;;  %s1017_s29 = sshll.u32 %s1619_s20, 4  ;;  %s1018_s29 = int_to_ptr.vmem [resolvable:$true] %s1017_s29 }
 0x13a   : > { %s1015_s24 = scalar_lea.hbm %s2833_s1, %s1164_s25  ;;  %s999_s30 = scalar_lea.sflag [#allocation4], %s1616_s4 }
 0x13b   : > { %s1308_s18 = scalar_lea.vmem %s1018_s29, 128  ;;  %s1465_s22 = smov [#allocation5]  }
 0x13c   : > { %p1309_p10 = scmp.ne.s32.totalorder %s1018_s29, %s1308_s18  ;;  %s1312_s23 = sshll.u32 %s1465_s22, 4  ;;  %s1313_s23 = int_to_ptr.vmem [resolvable:$false] %s1312_s23 }
 0x13d   : > { %s1314_s3 = scalar_lea.vmem %s1313_s23, 256  ;;  %p1315_p13 = scmp.lt.s32.totalorder %s1018_s29, %s1313_s23 }
 0x13e   : > { %p1310_p11 = pnand %p1309_p10, %p1583_p2  ;;  %p1316_p0 = scmp.lt.s32.totalorder %s1314_s3, %s1308_s18 }
 0x140   : > { %p1311_p12 = pneg %p1310_p11  ;;  %p1317_p5 = por %p1316_p0, %p1315_p13 }
 0x142   : > { %p1318_p1 = pnand %p1317_p5, %p1311_p12 }
 0x144   : > { %1321 = shalt.err (!%p1318_p1)
}
 0x145   : > { %s1322_s21 = scalar_lea.hbm %s1015_s24, 128  ;;  %s1326_s15 = scalar_lea.hbm %s2833_s1, 256 }
 0x146   : > { %p1323_p4 = scmp.ne.s32.totalorder %s1015_s24, %s1322_s21  ;;  %p1327_p9 = scmp.lt.s32.totalorder %s1015_s24, %s2833_s1 }
 0x147   : > { %p1328_p8 = scmp.lt.s32.totalorder %s1326_s15, %s1322_s21 }
 0x148   : > { %p1324_p7 = pnand %p1323_p4, %p1583_p2 }
 0x149   : > { %p1329_p10 = por %p1328_p8, %p1327_p9 }
 0x14a   : > { %p1325_p6 = pneg %p1324_p7 }
 0x14c   : > { %p1330_p11 = pnand %p1329_p10, %p1325_p6 }
 0x14e   : > { %1333 = shalt.err (!%p1330_p11)
}
 0x14f   : > { %1171 = dma.vmem_to_hbm [thread:$0]  (%p1583_p2), %s1018_s29, 128, %s1015_s24, %s999_s30  }
 0x150   : > { %s1028_s23 = scalar_lea.hbm %s2834_s2, %s1164_s25  ;;  %s1030_s3 = sshll.u32 %s1621_s6, 4  ;;  %s1031_s3 = int_to_ptr.vmem [resolvable:$true] %s1030_s3 }
 0x151   : > { %s1004_s20 = scalar_lea.sflag [#allocation7], %s1616_s4  ;;  %s1334_s26 = scalar_lea.vmem %s1031_s3, 128 }
 0x152   : > { %p1335_p12 = scmp.ne.s32.totalorder %s1031_s3, %s1334_s26  ;;  %s1466_s21 = smov [#allocation6]  }
 0x153   : > { %s1338_s15 = sshll.u32 %s1466_s21, 4  ;;  %s1339_s15 = int_to_ptr.vmem [resolvable:$false] %s1338_s15 }
 0x154   : > { %p1336_p13 = pnand %p1335_p12, %p1583_p2  ;;  %s1340_s28 = scalar_lea.vmem %s1339_s15, 256 }
 0x155   : > { %p1341_p5 = scmp.lt.s32.totalorder %s1031_s3, %s1339_s15  ;;  %p1342_p1 = scmp.lt.s32.totalorder %s1340_s28, %s1334_s26 }
 0x156   : > { %p1337_p0 = pneg %p1336_p13 }
 0x157   : > { %p1343_p4 = por %p1342_p1, %p1341_p5 }
 0x159   : > { %p1344_p7 = pnand %p1343_p4, %p1337_p0 }
 0x15b   : > { %1347 = shalt.err (!%p1344_p7)
}
 0x15c   : > { %s1348_s16 = scalar_lea.hbm %s1028_s23, 128  ;;  %s1352_s25 = scalar_lea.hbm %s2834_s2, 256 }
 0x15d   : > { %p1349_p6 = scmp.ne.s32.totalorder %s1028_s23, %s1348_s16  ;;  %p1353_p10 = scmp.lt.s32.totalorder %s1028_s23, %s2834_s2 }
 0x15e   : > { %p1354_p11 = scmp.lt.s32.totalorder %s1352_s25, %s1348_s16 }
 0x15f   : > { %p1350_p9 = pnand %p1349_p6, %p1583_p2 }
 0x160   : > { %p1355_p12 = por %p1354_p11, %p1353_p10 }
 0x161   : > { %p1351_p8 = pneg %p1350_p9 }
 0x163   : > { %p1356_p13 = pnand %p1355_p12, %p1351_p8 }
 0x165   : > { %1359 = shalt.err (!%p1356_p13)
}
 0x166   : > { %1172 = dma.vmem_to_hbm [thread:$0]  (%p1583_p2), %s1031_s3, 128, %s1028_s23, %s1004_s20  }
 0x167 PF: > { %p1187_p0 = scmp.ge.s32.totalorder %s1458_s19, 2  ;;  %s1042_s30 = sand.u32 1, %s1418_s9  }
 0x168   : > { %s1043_s27 = scalar_lea.sflag [#allocation4], %s1042_s30 }
 0x169   : > { %p1180_p5 = pnand %p1187_p0, %p1587_p3 }
 0x16b   : > { %p1181_p1 = pneg %p1180_p5 }
 0x16d   : > { %1409 = dma.done.wait (%p1181_p1), %s1043_s27, 128  }
 0x16e   : > { %1411 = vsyncadd (%p1181_p1), %s1043_s27, 4294967168  ;;  %s1052_s18 = scalar_lea.sflag [#allocation7], %s1042_s30 }
 0x16f   : > { %1413 = dma.done.wait (%p1181_p1), %s1052_s18, 128  }
 0x170   : > { %1415 = vsyncadd (%p1181_p1), %s1052_s18, 4294967168  ;;  %s22_s19 = sadd.s32 1, %s1458_s19   ;;  %s3148_s16 = sld [smem:[#allocation11_spill]] }
 0x171   : > { %p19_p4 = scmp.ge.s32.totalorder %s22_s19, 10   ;;  %s3149_s8 = sld [smem:[#allocation12_spill]] }
 0x172   : > { %s3150_s18 = sld [smem:[#allocation13_spill]]  ;;  %s3151_s9 = smov %s1422_s10 }
 0x173   : > { %s3152_s10 = smov %s1426_s11  ;;  %s3153_s11 = smov %s1570_s5 }
 0x174   : > { %s3154_s12 = smov %s1434_s13  ;;  %s3155_s13 = smov %s1438_s14 }
 0x175   : > { %s3156_s14 = smov %s1581_s7  ;;  %s3157_s15 = smov %s1450_s17 }
 0x176   :  { %21 = sbr.rel (!%p19_p4) target bundleno = 11 (0xb), region = 98 }
 0x177   : > { %s3158_s17 = smov %s3149_s8 }
 0x17b   :  { %1057 = vsyncpa [#allocation3], 1 }
 0x17c   :  { %1059 = vsyncpa [#allocation3 + $0x1], 1 }
 0x17d   :  { %1060 = vsyncpa [#allocation4], 1 }
 0x17e   :  { %1062 = vsyncpa [#allocation4 + $0x1], 1 }
 0x17f   :  { %1063 = vsyncpa [#allocation7], 1 }
 0x180   :  { %1065 = vsyncpa [#allocation7 + $0x1], 1 }

</bundles_post_ra>
